<compile_context>
chip_gen: v5e
topology: v5e:2x2
jax: 0.10.0
libtpu: 0.0.40
codegen_flags: <defaults>
</compile_context>

<pallas_src>
import functools

import jax
import jax.numpy as jnp
import numpy as np
from jax.experimental import pallas as pl
from jax.experimental.pallas import tpu as pltpu


def _tap_groups(C):
    """Split the 9 taps into K-chunks that land on (or near) MXU K-tile bounds."""
    if (4 * C) % 128 == 0:
        return (4, 4, 1)          # K = 4C, 4C, C   (e.g. C=32 -> 128,128,32; C=64 -> 256,256,64)
    return (3, 3, 3)              # K = 3C each


def _resblock_kernel(x_ref, w1_ref, b1_ref, w2_ref, b2_ref,
                     o_ref, pad_ref, col0_ref, col1_ref,
                     *, H, W, res_scale, groups):
    """One batch element per grid step.

    x_ref   : (C, PF)     f32   H-padded flat image, PF = (H+2)*W + 2
    w*_ref  : (C, 9C)     mmdt  conv weights, K ordered (kh, kw, c_in)
    b*_ref  : (C, 1)      f32
    o_ref   : (C, L)      f32   L = H*W  (final NCHW result, flattened)
    pad_ref : (C, PF)     mmdt  shared source buffer (x for conv1, h1 for conv2)
    col*_ref: (Gmax*C, L) mmdt  ping-pong im2col tap-group buffers
    """
    C = o_ref.shape[0]
    L = H * W
    LEAD = W + 1                       # offset of pixel (0, 0) inside the flat buffer
    col_refs = (col0_ref, col1_ref)

    # Wrap-around masks for the W halo (only H is padded): taps with kw==0 must
    # be zeroed where w == 0, taps with kw==2 where w == W-1.
    col_idx = jax.lax.broadcasted_iota(jnp.int32, (C, L), 1) % W
    left_ok = col_idx != 0
    right_ok = col_idx != (W - 1)

    def conv(w_ref):
        """im2col over tap groups + accumulating MXU dots, reading pad_ref."""
        h = None
        t0 = 0
        for gi, gs in enumerate(groups):
            buf = col_refs[gi % 2]
            for j in range(gs):
                kh, kw = divmod(t0 + j, 3)
                off = kh * W + kw
                sl = pad_ref[:, off:off + L]
                if kw == 0:
                    sl = jnp.where(left_ok, sl, jnp.zeros_like(sl))
                elif kw == 2:
                    sl = jnp.where(right_ok, sl, jnp.zeros_like(sl))
                buf[j * C:(j + 1) * C, :] = sl
            part = jnp.dot(w_ref[:, t0 * C:(t0 + gs) * C], buf[0:gs * C, :],
                           preferred_element_type=jnp.float32)
            h = part if h is None else h + part
            t0 += gs
        return h

    # ---- conv1 + bias + ReLU ------------------------------------------------
    # Single f32 -> matmul-dtype cast of the padded input (halo zeros included,
    # so no explicit halo zeroing is ever needed).
    pad_ref[...] = x_ref[...].astype(pad_ref.dtype)
    h1 = jnp.maximum(conv(w1_ref) + b1_ref[...], 0.0)

    # ---- re-pad h1 for conv2: halo lanes already zero from the x cast -------
    pad_ref[:, LEAD:LEAD + L] = h1.astype(pad_ref.dtype)

    # ---- conv2 + bias + residual --------------------------------------------
    h2 = conv(w2_ref) + b2_ref[...]
    x_id = x_ref[:, LEAD:LEAD + L]
    if res_scale == 1.0:               # trace-time branch (Python float)
        out = x_id + h2
    else:
        out = x_id + res_scale * h2
    o_ref[...] = out.astype(o_ref.dtype)


def residual_block_no_bn(x_nchw, w1_hwio, b1, w2_hwio, b2, res_scale=1.0,
                         matmul_dtype=jnp.bfloat16):
    """x_nchw: (N, C, H, W) f32; conv weights HWIO (3, 3, C, C); biases (C,)."""
    x = x_nchw.astype(jnp.float32)
    N, C, H, W = x.shape
    assert C % 16 == 0, "channel count must be a multiple of 16 (bf16 sublane tile)"
    L = H * W
    PF = (H + 2) * W + 2               # H-padded flat length (+1 lead, +1 trail)

    # Pad H only (the W halo is handled by in-kernel masks), flatten, add
    # one leading and one trailing zero element so every tap slice is in-range.
    xpad = jnp.pad(x, ((0, 0), (0, 0), (1, 1), (0, 0)))
    xpf = jnp.pad(xpad.reshape(N, C, (H + 2) * W), ((0, 0), (0, 0), (1, 1)))

    def to_mat(w):                     # HWIO (3,3,Cin,Cout) -> (Cout, 9*Cin), tap-major
        return jnp.transpose(w, (3, 0, 1, 2)).reshape(C, 9 * C).astype(matmul_dtype)

    w1m, w2m = to_mat(w1_hwio), to_mat(w2_hwio)
    b1c = b1.reshape(C, 1).astype(jnp.float32)
    b2c = b2.reshape(C, 1).astype(jnp.float32)

    groups = _tap_groups(C)
    gmax = max(groups)
    mm_bytes = jnp.dtype(matmul_dtype).itemsize

    # Shape-derived VMEM budget: double-buffered in/out blocks + weights +
    # scratch + f32 temporaries, with 1.5x headroom, capped by physical VMEM.
    need = (2 * C * PF * 4                        # input blocks (f32)
            + 2 * C * L * 4                       # output blocks (f32)
            + 2 * 2 * (9 * C * C) * mm_bytes      # weight blocks
            + 2 * 2 * C * 4                       # bias blocks
            + C * PF * mm_bytes                   # shared pad scratch
            + 2 * gmax * C * L * mm_bytes         # col ping-pong scratch
            + 4 * C * L * 4)                      # h1/h2/residual f32 temporaries
    try:
        phys_vmem = int(pltpu.get_tpu_info().vmem_capacity_bytes)
    except Exception:
        phys_vmem = 64 * 1024 * 1024
    vmem_limit = int(min(max(need * 3 // 2, 8 * 1024 * 1024),
                         int(phys_vmem * 0.75)))

    kernel = functools.partial(_resblock_kernel, H=H, W=W,
                               res_scale=float(res_scale), groups=groups)

    out_flat = pl.pallas_call(
        kernel,
        out_shape=jax.ShapeDtypeStruct((N, C, L), jnp.float32),
        grid_spec=pltpu.PrefetchScalarGridSpec(
            num_scalar_prefetch=0,
            grid=(N,),
            in_specs=[
                pl.BlockSpec((None, C, PF), lambda n: (n, 0, 0)),   # padded image
                pl.BlockSpec((C, 9 * C), lambda n: (0, 0)),          # w1
                pl.BlockSpec((C, 1), lambda n: (0, 0)),              # b1
                pl.BlockSpec((C, 9 * C), lambda n: (0, 0)),          # w2
                pl.BlockSpec((C, 1), lambda n: (0, 0)),              # b2
            ],
            out_specs=pl.BlockSpec((None, C, L), lambda n: (n, 0, 0)),
            scratch_shapes=[
                pltpu.VMEM((C, PF), matmul_dtype),           # shared x/h1 pad buffer
                pltpu.VMEM((gmax * C, L), matmul_dtype),     # col ping
                pltpu.VMEM((gmax * C, L), matmul_dtype),     # col pong
            ]),
        compiler_params=pltpu.CompilerParams(
            dimension_semantics=("parallel",),
            vmem_limit_bytes=vmem_limit),
    )(xpf, w1m, b1c, w2m, b2c)

    # Free reshape (row-major metadata only): no junk columns, no HBM slice.
    return out_flat.reshape(N, C, H, W)


def _reference(x_nchw, w1, b1, w2, b2, res_scale=1.0):
    """Pure-JAX f32 reference (lax conv) matching the PyTorch forward."""
    x = jnp.transpose(x_nchw, (0, 2, 3, 1))
    dn = jax.lax.conv_dimension_numbers(x.shape, w1.shape, ("NHWC", "HWIO", "NHWC"))
    h = jax.lax.conv_general_dilated(x, w1, (1, 1), "SAME", dimension_numbers=dn)
    h = jnp.maximum(h + b1.reshape(1, 1, 1, -1), 0.0)
    h2 = jax.lax.conv_general_dilated(h, w2, (1, 1), "SAME", dimension_numbers=dn)
    h2 = h2 + b2.reshape(1, 1, 1, -1)
    out = x + res_scale * h2
    return jnp.transpose(out, (0, 3, 1, 2))


if __name__ == "__main__":
    # Small shapes consistent with the module (mid_channels scaled down to 32).
    N, C, H, W = 2, 32, 16, 16
    res_scale = 1.0

    key = jax.random.PRNGKey(0)
    kx, kw1, kw2 = jax.random.split(key, 3)

    # Deterministic init mimicking kaiming fan_in init scaled by 0.1
    # (as in ResidualBlockNoBN.init_weights when res_scale == 1.0); biases zero.
    fan_in = 3 * 3 * C
    std = 0.1 * np.sqrt(2.0 / fan_in)
    w1 = jax.random.normal(kw1, (3, 3, C, C), dtype=jnp.float32) * std   # HWIO
    w2 = jax.random.normal(kw2, (3, 3, C, C), dtype=jnp.float32) * std   # HWIO
    b1 = jnp.zeros((C,), jnp.float32)
    b2 = jnp.zeros((C,), jnp.float32)

    x = jax.random.normal(kx, (N, C, H, W), dtype=jnp.float32)           # NCHW

    out = jax.block_until_ready(residual_block_no_bn(x, w1, b1, w2, b2, res_scale))
    ref = jax.block_until_ready(_reference(x, w1, b1, w2, b2, res_scale))

    # bf16 matmul inputs (f32 accumulation) -> slightly looser tolerance.
    np.testing.assert_allclose(np.asarray(out), np.asarray(ref), rtol=1e-2, atol=1e-2)

    print("KERNEL_OK")
</pallas_src>

<mosaic_0001>
module attributes {stable_mosaic.version = 11 : i64} {
  func.func @_resblock_kernel(%arg0: i32, %arg1: memref<1x32x290xf32, #tpu.memory_space<vmem>>, %arg2: memref<32x288xbf16, #tpu.memory_space<vmem>>, %arg3: memref<32x1xf32, #tpu.memory_space<vmem>>, %arg4: memref<32x288xbf16, #tpu.memory_space<vmem>>, %arg5: memref<32x1xf32, #tpu.memory_space<vmem>>, %arg6: memref<1x32x256xf32, #tpu.memory_space<vmem>>, %arg7: memref<32x290xbf16, #tpu.memory_space<vmem>>, %arg8: memref<128x256xbf16, #tpu.memory_space<vmem>>, %arg9: memref<128x256xbf16, #tpu.memory_space<vmem>>) attributes {dimension_semantics = [#tpu.dimension_semantics<parallel>], iteration_bounds = array<i64: 2>, scalar_prefetch = 0 : i64, scratch_operands = 3 : i64, tpu.core_type = #tpu.core_type<tc>, window_params = [{transform_indices = @transform_0, window_bounds = array<i64: 1, 32, 290>}, {pipeline_mode = #tpu.pipeline_mode<synchronous>, transform_indices = @transform_1, window_bounds = array<i64: 32, 288>}, {pipeline_mode = #tpu.pipeline_mode<synchronous>, transform_indices = @transform_2, window_bounds = array<i64: 32, 1>}, {pipeline_mode = #tpu.pipeline_mode<synchronous>, transform_indices = @transform_3, window_bounds = array<i64: 32, 288>}, {pipeline_mode = #tpu.pipeline_mode<synchronous>, transform_indices = @transform_4, window_bounds = array<i64: 32, 1>}, {transform_indices = @transform_5, window_bounds = array<i64: 1, 32, 256>}]} {
    %0 = tpu.iota {dimensions = array<i32: 1>} : vector<32x256xi32>
    %c16_i32 = arith.constant 16 : i32
    %c0_i32 = arith.constant 0 : i32
    %1 = arith.cmpi eq, %c16_i32, %c0_i32 : i32
    %c1_i32 = arith.constant 1 : i32
    %2 = arith.select %1, %c1_i32, %c16_i32 : i32
    %3 = vector.broadcast %2 : i32 to vector<32x256xi32>
    %4 = arith.remsi %0, %3 : vector<32x256xi32>
    %c0_i32_0 = arith.constant 0 : i32
    %5 = vector.broadcast %c0_i32_0 : i32 to vector<32x256xi32>
    %6 = arith.cmpi ne, %4, %5 : vector<32x256xi32>
    %c0_i32_1 = arith.constant 0 : i32
    %7 = vector.broadcast %c0_i32_1 : i32 to vector<32x256xi32>
    %8 = arith.cmpi slt, %4, %7 : vector<32x256xi32>
    %c0_i32_2 = arith.constant 0 : i32
    %9 = arith.cmpi slt, %2, %c0_i32_2 : i32
    %10 = vector.broadcast %9 : i1 to vector<32x256xi1>
    %11 = vector.broadcast %10 : vector<32x256xi1> to vector<32x256xi1>
    %12 = arith.xori %8, %11 : vector<32x256xi1>
    %13 = arith.andi %12, %6 : vector<32x256xi1>
    %14 = vector.broadcast %2 : i32 to vector<32x256xi32>
    %15 = arith.addi %4, %14 : vector<32x256xi32>
    %16 = arith.select %13, %15, %4 : vector<32x256xi1>, vector<32x256xi32>
    %c0_i32_3 = arith.constant 0 : i32
    %17 = vector.broadcast %c0_i32_3 : i32 to vector<32x256xi32>
    %18 = arith.cmpi ne, %16, %17 : vector<32x256xi32>
    %c15_i32 = arith.constant 15 : i32
    %19 = vector.broadcast %c15_i32 : i32 to vector<32x256xi32>
    %20 = arith.cmpi ne, %16, %19 : vector<32x256xi32>
    %c0 = arith.constant 0 : index
    %c0_4 = arith.constant 0 : index
    %c0_5 = arith.constant 0 : index
    %21 = vector.load %arg1[%c0, %c0_4, %c0_5] : memref<1x32x290xf32, #tpu.memory_space<vmem>>, vector<1x32x290xf32>
    %22 = vector.shape_cast %21 : vector<1x32x290xf32> to vector<32x290xf32>
    %23 = arith.truncf %22 : vector<32x290xf32> to vector<32x290xbf16>
    %c0_6 = arith.constant 0 : index
    %c0_7 = arith.constant 0 : index
    %24 = vector.load %arg7[%c0_6, %c0_7] : memref<32x290xbf16, #tpu.memory_space<vmem>>, vector<32x290xbf16>
    tpu.vector_store %arg7[%c0_6, %c0_7], %23 {strides = array<i32>} : memref<32x290xbf16, #tpu.memory_space<vmem>>, vector<32x290xbf16>,
    %c0_8 = arith.constant 0 : index
    %c0_9 = arith.constant 0 : index
    %25 = vector.load %arg7[%c0_8, %c0_9] : memref<32x290xbf16, #tpu.memory_space<vmem>>, vector<32x256xbf16>
    %cst = arith.constant 0.000000e+00 : bf16
    %26 = vector.broadcast %cst : bf16 to vector<32x256xbf16>
    %27 = arith.select %18, %25, %26 : vector<32x256xi1>, vector<32x256xbf16>
    %c0_10 = arith.constant 0 : index
    %c0_11 = arith.constant 0 : index
    %28 = vector.load %arg8[%c0_10, %c0_11] : memref<128x256xbf16, #tpu.memory_space<vmem>>, vector<32x256xbf16>
    tpu.vector_store %arg8[%c0_10, %c0_11], %27 {strides = array<i32>} : memref<128x256xbf16, #tpu.memory_space<vmem>>, vector<32x256xbf16>,
    %c0_12 = arith.constant 0 : index
    %c1 = arith.constant 1 : index
    %29 = vector.load %arg7[%c0_12, %c1] : memref<32x290xbf16, #tpu.memory_space<vmem>>, vector<32x256xbf16>
    %c32 = arith.constant 32 : index
    %c0_13 = arith.constant 0 : index
    %30 = vector.load %arg8[%c32, %c0_13] : memref<128x256xbf16, #tpu.memory_space<vmem>>, vector<32x256xbf16>
    tpu.vector_store %arg8[%c32, %c0_13], %29 {strides = array<i32>} : memref<128x256xbf16, #tpu.memory_space<vmem>>, vector<32x256xbf16>,
    %c0_14 = arith.constant 0 : index
    %c2 = arith.constant 2 : index
    %31 = vector.load %arg7[%c0_14, %c2] : memref<32x290xbf16, #tpu.memory_space<vmem>>, vector<32x256xbf16>
    %cst_15 = arith.constant 0.000000e+00 : bf16
    %32 = vector.broadcast %cst_15 : bf16 to vector<32x256xbf16>
    %33 = arith.select %20, %31, %32 : vector<32x256xi1>, vector<32x256xbf16>
    %c64 = arith.constant 64 : index
    %c0_16 = arith.constant 0 : index
    %34 = vector.load %arg8[%c64, %c0_16] : memref<128x256xbf16, #tpu.memory_space<vmem>>, vector<32x256xbf16>
    tpu.vector_store %arg8[%c64, %c0_16], %33 {strides = array<i32>} : memref<128x256xbf16, #tpu.memory_space<vmem>>, vector<32x256xbf16>,
    %c0_17 = arith.constant 0 : index
    %c16 = arith.constant 16 : index
    %35 = vector.load %arg7[%c0_17, %c16] : memref<32x290xbf16, #tpu.memory_space<vmem>>, vector<32x256xbf16>
    %cst_18 = arith.constant 0.000000e+00 : bf16
    %36 = vector.broadcast %cst_18 : bf16 to vector<32x256xbf16>
    %37 = arith.select %18, %35, %36 : vector<32x256xi1>, vector<32x256xbf16>
    %c96 = arith.constant 96 : index
    %c0_19 = arith.constant 0 : index
    %38 = vector.load %arg8[%c96, %c0_19] : memref<128x256xbf16, #tpu.memory_space<vmem>>, vector<32x256xbf16>
    tpu.vector_store %arg8[%c96, %c0_19], %37 {strides = array<i32>} : memref<128x256xbf16, #tpu.memory_space<vmem>>, vector<32x256xbf16>,
    %c0_20 = arith.constant 0 : index
    %c0_21 = arith.constant 0 : index
    %39 = vector.load %arg2[%c0_20, %c0_21] : memref<32x288xbf16, #tpu.memory_space<vmem>>, vector<32x128xbf16>
    %c0_22 = arith.constant 0 : index
    %c0_23 = arith.constant 0 : index
    %40 = vector.load %arg8[%c0_22, %c0_23] : memref<128x256xbf16, #tpu.memory_space<vmem>>, vector<128x256xbf16>
    %cst_24 = arith.constant dense<0.000000e+00> : vector<32x256xf32>
    %41 = tpu.matmul %39, %40, %cst_24 {dimension_numbers = #tpu.dot_dimension_numbers<[1], [0], [0], [1], [0, 0, 1, 1], [], []>} : vector<32x128xbf16>, vector<128x256xbf16>, vector<32x256xf32> -> vector<32x256xf32>
    %c0_25 = arith.constant 0 : index
    %c17 = arith.constant 17 : index
    %42 = vector.load %arg7[%c0_25, %c17] : memref<32x290xbf16, #tpu.memory_space<vmem>>, vector<32x256xbf16>
    %c0_26 = arith.constant 0 : index
    %c0_27 = arith.constant 0 : index
    %43 = vector.load %arg9[%c0_26, %c0_27] : memref<128x256xbf16, #tpu.memory_space<vmem>>, vector<32x256xbf16>
    tpu.vector_store %arg9[%c0_26, %c0_27], %42 {strides = array<i32>} : memref<128x256xbf16, #tpu.memory_space<vmem>>, vector<32x256xbf16>,
    %c0_28 = arith.constant 0 : index
    %c18 = arith.constant 18 : index
    %44 = vector.load %arg7[%c0_28, %c18] : memref<32x290xbf16, #tpu.memory_space<vmem>>, vector<32x256xbf16>
    %cst_29 = arith.constant 0.000000e+00 : bf16
    %45 = vector.broadcast %cst_29 : bf16 to vector<32x256xbf16>
    %46 = arith.select %20, %44, %45 : vector<32x256xi1>, vector<32x256xbf16>
    %c32_30 = arith.constant 32 : index
    %c0_31 = arith.constant 0 : index
    %47 = vector.load %arg9[%c32_30, %c0_31] : memref<128x256xbf16, #tpu.memory_space<vmem>>, vector<32x256xbf16>
    tpu.vector_store %arg9[%c32_30, %c0_31], %46 {strides = array<i32>} : memref<128x256xbf16, #tpu.memory_space<vmem>>, vector<32x256xbf16>,
    %c0_32 = arith.constant 0 : index
    %c32_33 = arith.constant 32 : index
    %48 = vector.load %arg7[%c0_32, %c32_33] : memref<32x290xbf16, #tpu.memory_space<vmem>>, vector<32x256xbf16>
    %cst_34 = arith.constant 0.000000e+00 : bf16
    %49 = vector.broadcast %cst_34 : bf16 to vector<32x256xbf16>
    %50 = arith.select %18, %48, %49 : vector<32x256xi1>, vector<32x256xbf16>
    %c64_35 = arith.constant 64 : index
    %c0_36 = arith.constant 0 : index
    %51 = vector.load %arg9[%c64_35, %c0_36] : memref<128x256xbf16, #tpu.memory_space<vmem>>, vector<32x256xbf16>
    tpu.vector_store %arg9[%c64_35, %c0_36], %50 {strides = array<i32>} : memref<128x256xbf16, #tpu.memory_space<vmem>>, vector<32x256xbf16>,
    %c0_37 = arith.constant 0 : index
    %c33 = arith.constant 33 : index
    %52 = vector.load %arg7[%c0_37, %c33] : memref<32x290xbf16, #tpu.memory_space<vmem>>, vector<32x256xbf16>
    %c96_38 = arith.constant 96 : index
    %c0_39 = arith.constant 0 : index
    %53 = vector.load %arg9[%c96_38, %c0_39] : memref<128x256xbf16, #tpu.memory_space<vmem>>, vector<32x256xbf16>
    tpu.vector_store %arg9[%c96_38, %c0_39], %52 {strides = array<i32>} : memref<128x256xbf16, #tpu.memory_space<vmem>>, vector<32x256xbf16>,
    %c0_40 = arith.constant 0 : index
    %c128 = arith.constant 128 : index
    %54 = vector.load %arg2[%c0_40, %c128] : memref<32x288xbf16, #tpu.memory_space<vmem>>, vector<32x128xbf16>
    %c0_41 = arith.constant 0 : index
    %c0_42 = arith.constant 0 : index
    %55 = vector.load %arg9[%c0_41, %c0_42] : memref<128x256xbf16, #tpu.memory_space<vmem>>, vector<128x256xbf16>
    %cst_43 = arith.constant dense<0.000000e+00> : vector<32x256xf32>
    %56 = tpu.matmul %54, %55, %cst_43 {dimension_numbers = #tpu.dot_dimension_numbers<[1], [0], [0], [1], [0, 0, 1, 1], [], []>} : vector<32x128xbf16>, vector<128x256xbf16>, vector<32x256xf32> -> vector<32x256xf32>
    %57 = arith.addf %41, %56 : vector<32x256xf32>
    %c0_44 = arith.constant 0 : index
    %c34 = arith.constant 34 : index
    %58 = vector.load %arg7[%c0_44, %c34] : memref<32x290xbf16, #tpu.memory_space<vmem>>, vector<32x256xbf16>
    %cst_45 = arith.constant 0.000000e+00 : bf16
    %59 = vector.broadcast %cst_45 : bf16 to vector<32x256xbf16>
    %60 = arith.select %20, %58, %59 : vector<32x256xi1>, vector<32x256xbf16>
    %c0_46 = arith.constant 0 : index
    %c0_47 = arith.constant 0 : index
    %61 = vector.load %arg8[%c0_46, %c0_47] : memref<128x256xbf16, #tpu.memory_space<vmem>>, vector<32x256xbf16>
    tpu.vector_store %arg8[%c0_46, %c0_47], %60 {strides = array<i32>} : memref<128x256xbf16, #tpu.memory_space<vmem>>, vector<32x256xbf16>,
    %c0_48 = arith.constant 0 : index
    %c256 = arith.constant 256 : index
    %62 = vector.load %arg2[%c0_48, %c256] : memref<32x288xbf16, #tpu.memory_space<vmem>>, vector<32x32xbf16>
    %c0_49 = arith.constant 0 : index
    %c0_50 = arith.constant 0 : index
    %63 = vector.load %arg8[%c0_49, %c0_50] : memref<128x256xbf16, #tpu.memory_space<vmem>>, vector<32x256xbf16>
    %cst_51 = arith.constant dense<0.000000e+00> : vector<32x256xf32>
    %64 = tpu.matmul %62, %63, %cst_51 {dimension_numbers = #tpu.dot_dimension_numbers<[1], [0], [0], [1], [0, 0, 1, 1], [], []>} : vector<32x32xbf16>, vector<32x256xbf16>, vector<32x256xf32> -> vector<32x256xf32>
    %65 = arith.addf %57, %64 : vector<32x256xf32>
    %c0_52 = arith.constant 0 : index
    %c0_53 = arith.constant 0 : index
    %66 = vector.load %arg3[%c0_52, %c0_53] : memref<32x1xf32, #tpu.memory_space<vmem>>, vector<32x1xf32>
    %67 = vector.broadcast %66 : vector<32x1xf32> to vector<32x256xf32>
    %68 = arith.addf %65, %67 : vector<32x256xf32>
    %cst_54 = arith.constant 0.000000e+00 : f32
    %69 = vector.broadcast %cst_54 : f32 to vector<32x256xf32>
    %70 = arith.maximumf %68, %69 : vector<32x256xf32>
    %71 = arith.truncf %70 : vector<32x256xf32> to vector<32x256xbf16>
    %c0_55 = arith.constant 0 : index
    %c17_56 = arith.constant 17 : index
    %72 = vector.load %arg7[%c0_55, %c17_56] : memref<32x290xbf16, #tpu.memory_space<vmem>>, vector<32x256xbf16>
    tpu.vector_store %arg7[%c0_55, %c17_56], %71 {strides = array<i32>} : memref<32x290xbf16, #tpu.memory_space<vmem>>, vector<32x256xbf16>,
    %c0_57 = arith.constant 0 : index
    %c0_58 = arith.constant 0 : index
    %73 = vector.load %arg7[%c0_57, %c0_58] : memref<32x290xbf16, #tpu.memory_space<vmem>>, vector<32x256xbf16>
    %cst_59 = arith.constant 0.000000e+00 : bf16
    %74 = vector.broadcast %cst_59 : bf16 to vector<32x256xbf16>
    %75 = arith.select %18, %73, %74 : vector<32x256xi1>, vector<32x256xbf16>
    %c0_60 = arith.constant 0 : index
    %c0_61 = arith.constant 0 : index
    %76 = vector.load %arg8[%c0_60, %c0_61] : memref<128x256xbf16, #tpu.memory_space<vmem>>, vector<32x256xbf16>
    tpu.vector_store %arg8[%c0_60, %c0_61], %75 {strides = array<i32>} : memref<128x256xbf16, #tpu.memory_space<vmem>>, vector<32x256xbf16>,
    %c0_62 = arith.constant 0 : index
    %c1_63 = arith.constant 1 : index
    %77 = vector.load %arg7[%c0_62, %c1_63] : memref<32x290xbf16, #tpu.memory_space<vmem>>, vector<32x256xbf16>
    %c32_64 = arith.constant 32 : index
    %c0_65 = arith.constant 0 : index
    %78 = vector.load %arg8[%c32_64, %c0_65] : memref<128x256xbf16, #tpu.memory_space<vmem>>, vector<32x256xbf16>
    tpu.vector_store %arg8[%c32_64, %c0_65], %77 {strides = array<i32>} : memref<128x256xbf16, #tpu.memory_space<vmem>>, vector<32x256xbf16>,
    %c0_66 = arith.constant 0 : index
    %c2_67 = arith.constant 2 : index
    %79 = vector.load %arg7[%c0_66, %c2_67] : memref<32x290xbf16, #tpu.memory_space<vmem>>, vector<32x256xbf16>
    %cst_68 = arith.constant 0.000000e+00 : bf16
    %80 = vector.broadcast %cst_68 : bf16 to vector<32x256xbf16>
    %81 = arith.select %20, %79, %80 : vector<32x256xi1>, vector<32x256xbf16>
    %c64_69 = arith.constant 64 : index
    %c0_70 = arith.constant 0 : index
    %82 = vector.load %arg8[%c64_69, %c0_70] : memref<128x256xbf16, #tpu.memory_space<vmem>>, vector<32x256xbf16>
    tpu.vector_store %arg8[%c64_69, %c0_70], %81 {strides = array<i32>} : memref<128x256xbf16, #tpu.memory_space<vmem>>, vector<32x256xbf16>,
    %c0_71 = arith.constant 0 : index
    %c16_72 = arith.constant 16 : index
    %83 = vector.load %arg7[%c0_71, %c16_72] : memref<32x290xbf16, #tpu.memory_space<vmem>>, vector<32x256xbf16>
    %cst_73 = arith.constant 0.000000e+00 : bf16
    %84 = vector.broadcast %cst_73 : bf16 to vector<32x256xbf16>
    %85 = arith.select %18, %83, %84 : vector<32x256xi1>, vector<32x256xbf16>
    %c96_74 = arith.constant 96 : index
    %c0_75 = arith.constant 0 : index
    %86 = vector.load %arg8[%c96_74, %c0_75] : memref<128x256xbf16, #tpu.memory_space<vmem>>, vector<32x256xbf16>
    tpu.vector_store %arg8[%c96_74, %c0_75], %85 {strides = array<i32>} : memref<128x256xbf16, #tpu.memory_space<vmem>>, vector<32x256xbf16>,
    %c0_76 = arith.constant 0 : index
    %c0_77 = arith.constant 0 : index
    %87 = vector.load %arg4[%c0_76, %c0_77] : memref<32x288xbf16, #tpu.memory_space<vmem>>, vector<32x128xbf16>
    %c0_78 = arith.constant 0 : index
    %c0_79 = arith.constant 0 : index
    %88 = vector.load %arg8[%c0_78, %c0_79] : memref<128x256xbf16, #tpu.memory_space<vmem>>, vector<128x256xbf16>
    %cst_80 = arith.constant dense<0.000000e+00> : vector<32x256xf32>
    %89 = tpu.matmul %87, %88, %cst_80 {dimension_numbers = #tpu.dot_dimension_numbers<[1], [0], [0], [1], [0, 0, 1, 1], [], []>} : vector<32x128xbf16>, vector<128x256xbf16>, vector<32x256xf32> -> vector<32x256xf32>
    %c0_81 = arith.constant 0 : index
    %c17_82 = arith.constant 17 : index
    %90 = vector.load %arg7[%c0_81, %c17_82] : memref<32x290xbf16, #tpu.memory_space<vmem>>, vector<32x256xbf16>
    %c0_83 = arith.constant 0 : index
    %c0_84 = arith.constant 0 : index
    %91 = vector.load %arg9[%c0_83, %c0_84] : memref<128x256xbf16, #tpu.memory_space<vmem>>, vector<32x256xbf16>
    tpu.vector_store %arg9[%c0_83, %c0_84], %90 {strides = array<i32>} : memref<128x256xbf16, #tpu.memory_space<vmem>>, vector<32x256xbf16>,
    %c0_85 = arith.constant 0 : index
    %c18_86 = arith.constant 18 : index
    %92 = vector.load %arg7[%c0_85, %c18_86] : memref<32x290xbf16, #tpu.memory_space<vmem>>, vector<32x256xbf16>
    %cst_87 = arith.constant 0.000000e+00 : bf16
    %93 = vector.broadcast %cst_87 : bf16 to vector<32x256xbf16>
    %94 = arith.select %20, %92, %93 : vector<32x256xi1>, vector<32x256xbf16>
    %c32_88 = arith.constant 32 : index
    %c0_89 = arith.constant 0 : index
    %95 = vector.load %arg9[%c32_88, %c0_89] : memref<128x256xbf16, #tpu.memory_space<vmem>>, vector<32x256xbf16>
    tpu.vector_store %arg9[%c32_88, %c0_89], %94 {strides = array<i32>} : memref<128x256xbf16, #tpu.memory_space<vmem>>, vector<32x256xbf16>,
    %c0_90 = arith.constant 0 : index
    %c32_91 = arith.constant 32 : index
    %96 = vector.load %arg7[%c0_90, %c32_91] : memref<32x290xbf16, #tpu.memory_space<vmem>>, vector<32x256xbf16>
    %cst_92 = arith.constant 0.000000e+00 : bf16
    %97 = vector.broadcast %cst_92 : bf16 to vector<32x256xbf16>
    %98 = arith.select %18, %96, %97 : vector<32x256xi1>, vector<32x256xbf16>
    %c64_93 = arith.constant 64 : index
    %c0_94 = arith.constant 0 : index
    %99 = vector.load %arg9[%c64_93, %c0_94] : memref<128x256xbf16, #tpu.memory_space<vmem>>, vector<32x256xbf16>
    tpu.vector_store %arg9[%c64_93, %c0_94], %98 {strides = array<i32>} : memref<128x256xbf16, #tpu.memory_space<vmem>>, vector<32x256xbf16>,
    %c0_95 = arith.constant 0 : index
    %c33_96 = arith.constant 33 : index
    %100 = vector.load %arg7[%c0_95, %c33_96] : memref<32x290xbf16, #tpu.memory_space<vmem>>, vector<32x256xbf16>
    %c96_97 = arith.constant 96 : index
    %c0_98 = arith.constant 0 : index
    %101 = vector.load %arg9[%c96_97, %c0_98] : memref<128x256xbf16, #tpu.memory_space<vmem>>, vector<32x256xbf16>
    tpu.vector_store %arg9[%c96_97, %c0_98], %100 {strides = array<i32>} : memref<128x256xbf16, #tpu.memory_space<vmem>>, vector<32x256xbf16>,
    %c0_99 = arith.constant 0 : index
    %c128_100 = arith.constant 128 : index
    %102 = vector.load %arg4[%c0_99, %c128_100] : memref<32x288xbf16, #tpu.memory_space<vmem>>, vector<32x128xbf16>
    %c0_101 = arith.constant 0 : index
    %c0_102 = arith.constant 0 : index
    %103 = vector.load %arg9[%c0_101, %c0_102] : memref<128x256xbf16, #tpu.memory_space<vmem>>, vector<128x256xbf16>
    %cst_103 = arith.constant dense<0.000000e+00> : vector<32x256xf32>
    %104 = tpu.matmul %102, %103, %cst_103 {dimension_numbers = #tpu.dot_dimension_numbers<[1], [0], [0], [1], [0, 0, 1, 1], [], []>} : vector<32x128xbf16>, vector<128x256xbf16>, vector<32x256xf32> -> vector<32x256xf32>
    %105 = arith.addf %89, %104 : vector<32x256xf32>
    %c0_104 = arith.constant 0 : index
    %c34_105 = arith.constant 34 : index
    %106 = vector.load %arg7[%c0_104, %c34_105] : memref<32x290xbf16, #tpu.memory_space<vmem>>, vector<32x256xbf16>
    %cst_106 = arith.constant 0.000000e+00 : bf16
    %107 = vector.broadcast %cst_106 : bf16 to vector<32x256xbf16>
    %108 = arith.select %20, %106, %107 : vector<32x256xi1>, vector<32x256xbf16>
    %c0_107 = arith.constant 0 : index
    %c0_108 = arith.constant 0 : index
    %109 = vector.load %arg8[%c0_107, %c0_108] : memref<128x256xbf16, #tpu.memory_space<vmem>>, vector<32x256xbf16>
    tpu.vector_store %arg8[%c0_107, %c0_108], %108 {strides = array<i32>} : memref<128x256xbf16, #tpu.memory_space<vmem>>, vector<32x256xbf16>,
    %c0_109 = arith.constant 0 : index
    %c256_110 = arith.constant 256 : index
    %110 = vector.load %arg4[%c0_109, %c256_110] : memref<32x288xbf16, #tpu.memory_space<vmem>>, vector<32x32xbf16>
    %c0_111 = arith.constant 0 : index
    %c0_112 = arith.constant 0 : index
    %111 = vector.load %arg8[%c0_111, %c0_112] : memref<128x256xbf16, #tpu.memory_space<vmem>>, vector<32x256xbf16>
    %cst_113 = arith.constant dense<0.000000e+00> : vector<32x256xf32>
    %112 = tpu.matmul %110, %111, %cst_113 {dimension_numbers = #tpu.dot_dimension_numbers<[1], [0], [0], [1], [0, 0, 1, 1], [], []>} : vector<32x32xbf16>, vector<32x256xbf16>, vector<32x256xf32> -> vector<32x256xf32>
    %113 = arith.addf %105, %112 : vector<32x256xf32>
    %c0_114 = arith.constant 0 : index
    %c0_115 = arith.constant 0 : index
    %114 = vector.load %arg5[%c0_114, %c0_115] : memref<32x1xf32, #tpu.memory_space<vmem>>, vector<32x1xf32>
    %115 = vector.broadcast %114 : vector<32x1xf32> to vector<32x256xf32>
    %116 = arith.addf %113, %115 : vector<32x256xf32>
    %c0_116 = arith.constant 0 : index
    %c0_117 = arith.constant 0 : index
    %c17_118 = arith.constant 17 : index
    %117 = vector.load %arg1[%c0_116, %c0_117, %c17_118] : memref<1x32x290xf32, #tpu.memory_space<vmem>>, vector<1x32x256xf32>
    %118 = vector.shape_cast %117 : vector<1x32x256xf32> to vector<32x256xf32>
    %119 = arith.addf %118, %116 : vector<32x256xf32>
    %c0_119 = arith.constant 0 : index
    %c0_120 = arith.constant 0 : index
    %c0_121 = arith.constant 0 : index
    %120 = vector.load %arg6[%c0_119, %c0_120, %c0_121] : memref<1x32x256xf32, #tpu.memory_space<vmem>>, vector<1x32x256xf32>
    %121 = vector.shape_cast %120 : vector<1x32x256xf32> to vector<32x256xf32>
    %122 = vector.shape_cast %119 : vector<32x256xf32> to vector<1x32x256xf32>
    tpu.vector_store %arg6[%c0_119, %c0_120, %c0_121], %122 {strides = array<i32>} : memref<1x32x256xf32, #tpu.memory_space<vmem>>, vector<1x32x256xf32>,
    return
  }
  func.func @transform_0(%arg0: i32) -> (i32, i32, i32) {
    %c0_i32 = arith.constant 0 : i32
    %c0_i32_0 = arith.constant 0 : i32
    %c0_i32_1 = arith.constant 0 : i32
    return %arg0, %c0_i32, %c0_i32_0 : i32, i32, i32
  }
  func.func @transform_1(%arg0: i32) -> (i32, i32) {
    %c0_i32 = arith.constant 0 : i32
    %c0_i32_0 = arith.constant 0 : i32
    %c0_i32_1 = arith.constant 0 : i32
    return %c0_i32, %c0_i32_0 : i32, i32
  }
  func.func @transform_2(%arg0: i32) -> (i32, i32) {
    %c0_i32 = arith.constant 0 : i32
    %c0_i32_0 = arith.constant 0 : i32
    %c0_i32_1 = arith.constant 0 : i32
    return %c0_i32, %c0_i32_0 : i32, i32
  }
  func.func @transform_3(%arg0: i32) -> (i32, i32) {
    %c0_i32 = arith.constant 0 : i32
    %c0_i32_0 = arith.constant 0 : i32
    %c0_i32_1 = arith.constant 0 : i32
    return %c0_i32, %c0_i32_0 : i32, i32
  }
  func.func @transform_4(%arg0: i32) -> (i32, i32) {
    %c0_i32 = arith.constant 0 : i32
    %c0_i32_0 = arith.constant 0 : i32
    %c0_i32_1 = arith.constant 0 : i32
    return %c0_i32, %c0_i32_0 : i32, i32
  }
  func.func @transform_5(%arg0: i32) -> (i32, i32, i32) {
    %c0_i32 = arith.constant 0 : i32
    %c0_i32_0 = arith.constant 0 : i32
    %c0_i32_1 = arith.constant 0 : i32
    return %arg0, %c0_i32, %c0_i32_0 : i32, i32, i32
  }
}

</mosaic_0001>

<bundles_post_ra>
// kernel: tpu_custom_call.1
= control target key start
LH: loop header
LB: loop body
LE: loop exit
PB: predicated region body
PF: predicated region fallthrough
CT: control target
= control target key end

     0   :  { %s4276_s0 = inlined_call_operand.hbm [shape: f32[2,32,290], index: 0, kind: input, shape index: {}]   ;;  %s4277_s1 = inlined_call_operand.vmem [shape: bf16[32,288], index: 1, kind: input, shape index: {}]   ;;  %s4278_s2 = inlined_call_operand.vmem [shape: f32[32,1], index: 2, kind: input, shape index: {}]   ;;  %s4279_s3 = inlined_call_operand.hbm [shape: bf16[32,288], index: 3, kind: input, shape index: {}]   ;;  %s4280_s4 = inlined_call_operand.vmem [shape: f32[32,1], index: 4, kind: input, shape index: {}]   ;;  %s4281_s5 = inlined_call_operand.hbm [shape: f32[2,32,256], index: 5, kind: output, shape index: {}]  }
   0x1   :  { %4296 = sst [smem:[#allocation14_spill]] %s4279_s3 }
   0x2   :  { %10 = vsyncpa [#allocation6], 0 }
   0x3   :  { %12 = vsyncpa [#allocation6 + $0x1], 0 }
   0x4   :  { %13 = vsyncpa [#allocation9], 0 }
   0x5   :  { %14 = vsyncpa [#allocation7], 0 }
   0x6   :  { %16 = vsyncpa [#allocation7 + $0x1], 0  ;;  %s3264_s18 = smov 0   ;;  %s3266_s19 = smov 0  }
   0x7   :  { %s3268_s20 = smov 0   ;;  %s3270_s21 = smov 0  }
   0x8 LB: > { %s3285_s22 = sadd.s32 4294967295, %s3211_s21   ;;  %s2556_s23 = sadd.s32 4294967294, %s3211_s21   ;;  %s3211_s21 = sphi %s3270_s21, %s4446_s21   ;;  %s3207_s20 = sphi %s3268_s20, %s4445_s20   ;;  %s3203_s19 = sphi %s3266_s19, %s4444_s19   ;;  %s3199_s18 = sphi %s3264_s18, %s4443_s18  }
   0x9   : > { %p42_p0 = scmp.ne.s32.totalorder %s3203_s19, %s3199_s18  ;;  %p43_p1 = scmp.eq.s32.totalorder %s3285_s22, 0 }
   0xa   : > { %p150_p2 = scmp.eq.s32.totalorder %s3285_s22, 1  ;;  %p156_p3 = scmp.eq.s32.totalorder %s2556_s23, 1 }
   0xb   : > { %p3294_p4 = por %p43_p1, %p42_p0  ;;  %p2557_p5 = scmp.ge.s32.totalorder %s3211_s21, 1 }
   0xc   : > { %p3299_p6 = por %p156_p3, %p42_p0  ;;  %p163_p7 = scmp.lt.s32.totalorder %s3211_s21, 3 }
   0xd   : > { %s4299_s3 = sld [smem:[#allocation14_spill]]  ;;  %s3213_s30 = smov [#allocation8]  }
   0xe   : > { %p3307_p8 = pnand %p2557_p5, %p163_p7  ;;  %s182_s6 = sshll.u32 %s3213_s30, 4  ;;  %s183_s6 = int_to_ptr.vmem [resolvable:$true] %s182_s6 }
   0xf   : > { %s3317_s7 = sadd.s32 1, %s3211_s21   ;;  %s3214_s8 = smov 192  }
  0x10   : > { %p3009_p9 = pneg %p3307_p8  ;;  %s3215_s9 = smov 12  }
  0x11   : > { %s26_s10 = ssub.s32 %s3211_s21, %s3317_s7  ;;  %s29_s11 = sadd.s32 1, %s3207_s20 }
  0x12   : > { %p3010_p10 = pnand %p3009_p9, %p43_p1  ;;  %p27_p12 = scmp.eq.s32.totalorder %s26_s10, 0 }
  0x13   : > { %s180_s28 = sshll.u32 %s4299_s3, 4  ;;  %p36_p13 = scmp.ne.s32.totalorder %s3207_s20, %s3203_s19  ;;  %s181_s28 = int_to_ptr.hbm [resolvable:$true] %s180_s28 }
  0x14   : > { %3012 = dma.hbm_to_vmem [thread:$0]  (!%p3010_p10), %s181_s28, 768, %s183_s6, [#allocation9], %s3214_s8, %s3214_s8, %s3215_s9  }
  0x15   : > { %p37_p0 = scmp.eq.s32.totalorder %s3211_s21, 0  ;;  %p3022_p3 = scmp.lt.s32.totalorder %s3211_s21, 2 }
  0x16   : > { %s3327_s12 = scalar_select %p27_p12, %s3207_s20, %s29_s11  }
  0x17   : > { %p38_p5 = por %p37_p0, %p36_p13  ;;  %p3331_p7 = por %p150_p2, %p36_p13 }
  0x18   : > { %s199_s14 = sand.u32 1, %s3207_s20   ;;  %s2999_s15 = smul.u32 96, %s3211_s21 }
  0x19   : > { %s2998_s16 = smul.u32 96, %s199_s14  ;;  %p3340_p9 = pnand %p3022_p3, %p38_p5 }
  0x1a   : > { %s208_s26 = scalar_lea.hbm %s4276_s0, %s2999_s15  ;;  %s200_s8 = scalar_lea.sflag [#allocation6], %s199_s14 }
  0x1b   : > { %s209_s28 = sshll.u32 %s208_s26, 4  ;;  %s203_s30 = scalar_lea.vmem [#allocation5], %s2998_s16  ;;  %s210_s28 = int_to_ptr.hbm [resolvable:$true] %s209_s28 }
  0x1c   : > { %s211_s6 = sshll.u32 %s203_s30, 4  ;;  %s3111_s9 = sshra.s32 %s210_s28, 4  ;;  %s212_s6 = int_to_ptr.vmem [resolvable:$true] %s211_s6  ;;  %s3112_s9 = int_to_ptr.hbm [resolvable:$true] %s3111_s9 }
  0x1d   : > { %s3113_s10 = scalar_lea.hbm %s3112_s9, 96  ;;  %p3115_p10 = pneg %p3340_p9 }
  0x1e   : > { %p3114_p2 = scmp.ne.s32.totalorder %s3112_s9, %s3113_s10  ;;  %s3118_s17 = scalar_lea.hbm %s4276_s0, 192 }
  0x1f   : > { %p3119_p0 = scmp.lt.s32.totalorder %s3112_s9, %s4276_s0  ;;  %p3120_p3 = scmp.lt.s32.totalorder %s3118_s17, %s3113_s10 }
  0x20   : > { %p3116_p12 = pnand %p3115_p10, %p3114_p2 }
  0x21   : > { %p3121_p5 = por %p3120_p3, %p3119_p0 }
  0x22   : > { %p3117_p13 = pneg %p3116_p12 }
  0x24   : > { %p3122_p11 = pnand %p3121_p5, %p3117_p13 }
  0x26   : > { %3125 = shalt.err (!%p3122_p11)
}
  0x27   : > { %s3216_s14 = smov 384   ;;  %s3217_s16 = smov 24  }
  0x28   : > { %3016 = dma.hbm_to_vmem [thread:$0]  (!%p3340_p9), %s210_s28, 1536, %s212_s6, %s200_s8, %s3216_s14, %s3216_s14, %s3217_s16  }
  0x29   : > { %223 = sbr.rel (%p3307_p8) target bundleno = 1393 (0x571), region = 40  ;;  %s3357_s26 = sand.u32 (!%p3307_p8), 1, %s3203_s19  }
  0x2a   : > { %s3000_s3 = smul.u32 (!%p3307_p8), 96, %s3357_s26  ;;  %s226_s30 = scalar_lea.sflag (!%p3307_p8), [#allocation6], %s3357_s26 }
  0x2c   : > { %s3361_s9 = scalar_lea.vmem (!%p3307_p8), [#allocation5], %s3000_s3 }
  0x2e   : > { %3186 = dma.done.wait (%p3294_p4), %s226_s30, 1536  }
  0x2f   : > { %3188 = vsyncadd (%p3294_p4), %s226_s30, 4294965760  ;;  %v265_v0 = vlaneseq }
  0x30   : > { %3190 = dma.done.wait (%p43_p1), [#allocation9], 768  }
  0x31   : > { %3192 = vsyncadd (%p43_p1), [#allocation9], 4294966528  ;;  %v3218_v1 = vmov 0   ;;  %v266_v2 = vand.u32 127, %v265_v0  ;;  %v302_v6 = vld [vmem:[%s3361_s9 + $0x30] sm:$0xff]  ;;  %v303_v7 = vld [vmem:[%s3361_s9 + $0x38] sm:$0xff] }
  0x32   : > { %3079 = vset.pattern.permute.xlu1 %v3218_v1  ;;  %3078 = vset.pattern.permute.xlu0 %v3218_v1  ;;  %v307_v8 = vld [vmem:[%s3361_s9 + $0x58] sm:$0xff]  ;;  %v3377_v9 = vpack.c.bf16 %v303_v7, %v302_v6  ;;  %vm317_vm2 = vcmask 273408   ;;  %v305_v11 = vld [vmem:[%s3361_s9 + $0x48] sm:$0xff]  ;;  %v306_v12 = vld [vmem:[%s3361_s9 + $0x50] sm:$0xff]  ;;  %s3219_s24 = smov 95   ;;  %s3220_s29 = smov 32   ;;  %v3452_v41 = vunpack.c.l.b16 %v3218_v1  ;;  %v3455_v42 = vunpack.c.h.b16 %v3218_v1 }
  0x33   : > { %3080 = vset.pattern.permute.xlu2 %v3218_v1  ;;  %v267_v3 = vadd.s32 128, %v266_v2  ;;  %v272_v4 = vand.u32 15, %v266_v2  ;;  %v315_v10 = vpack.c.bf16 %v307_v8, %v307_v8  ;;  %v304_v13 = vld [vmem:[%s3361_s9 + $0x40] sm:$0xff]  ;;  %v299_v16 = vld [vmem:[%s3361_s9 + $0x18] sm:$0xff]  ;;  %v3402_v21 = vpack.c.bf16 %v306_v12, %v305_v11  ;;  %v298_v22 = vld [vmem:[%s3361_s9 + $0x10] sm:$0xff]  ;;  %s4291_s27 = smov 16  }
  0x34   : > { %v313_v15 = vpack.c.bf16 %v304_v13, %v304_v13  ;;  %v300_v17 = vld [vmem:[%s3361_s9 + $0x20] sm:$0xff]  ;;  %321 = vst [vmem:[#allocation2 + $0x18] sm:$0xff] %v3377_v9  ;;  %836 = vrot.lane.b32.xlu2 %v3377_v9, %s3219_s24  ;;  %v309_v24 = vpack.c.bf16 %v298_v22, %v298_v22  ;;  %v297_v25 = vld [vmem:[%s3361_s9 + $0x8] sm:$0xff]  ;;  %s3222_s28 = smov 18   ;;  %s3223_s6 = smov 2   ;;  %vm409_vm10 = vcmask 15360  }
  0x35   : > { %v279_v5 = vand.u32 15, %v267_v3  ;;  %vm292_vm0 = vcmp.ne.s32.totalorder %v272_v4, 0  ;;  %vm3391_vm4 = vcmp.ne.s32.totalorder %v272_v4, 15  ;;  %v296_v23 = vld [vmem:[%s3361_s9] sm:$0xff]  ;;  %324 = vst.msk [vmem:[#allocation2 + $0x2c] sm:$0xf] %vm317_vm2, %v315_v10  ;;  %v3411_v27 = vpack.c.bf16 %v300_v17, %v299_v16 }
  0x36   : > { %v301_v26 = vld [vmem:[%s3361_s9 + $0x28] sm:$0xff]  ;;  %323 = vst [vmem:[#allocation2 + $0x24] sm:$0xff] %v3402_v21  ;;  %v3419_v29 = vpack.c.bf16 %v297_v25, %v296_v23  ;;  %s3224_s8 = smov 34   ;;  %s3225_s10 = smov 111  }
  0x37   : > { %vm293_vm1 = vcmp.ne.s32.totalorder %v279_v5, 0  ;;  %vm3395_vm5 = vcmp.ne.s32.totalorder %v279_v5, 15  ;;  %322 = vst.msk [vmem:[#allocation2 + $0x20] sm:$0xf] %vm317_vm2, %v313_v15  ;;  %v311_v28 = vpack.c.bf16 %v301_v26, %v301_v26  ;;  %s3226_s11 = smov 96   ;;  %s3227_s15 = smov 110  }
  0x38   : > { %vm3382_vm3 = vmpackc.low %vm293_vm1, %vm292_vm0  ;;  %319 = vst [vmem:[#allocation2 + $0xc] sm:$0xff] %v3411_v27  ;;  %s3228_s17 = smov 112   ;;  %s3229_s23 = smov 126  }
  0x39   : > { %v490_v18 = vsel %vm3382_vm3, 65537, %v3218_v1  ;;  %vm404_vm6 = vmpackc.low %vm3395_vm5, %vm3391_vm4  ;;  %318 = vst.msk [vmem:[#allocation2 + $0x8] sm:$0xf] %vm317_vm2, %v309_v24  ;;  %vm4284_vm4 = vcmask 1043456   ;;  %vm4282_vm5 = vcmask 777216   ;;  %s3230_s14 = smov 127  }
  0x3a   : > { %736 = vrot.lane.b32.xlu0 %v490_v18, %s3220_s29  ;;  %491 = vrot.lane.b32.xlu1 %v490_v18, %s4291_s27  ;;  %v405_v30 = vsel %vm404_vm6, 65537, %v3218_v1  ;;  %316 = vst [vmem:[#allocation2] sm:$0xff] %v3419_v29  ;;  %s4292_s16 = smov 94   ;;  %s3232_s29 = smov 17  }
  0x3b   : > { %320 = vst.msk [vmem:[#allocation2 + $0x14] sm:$0xf] %vm317_vm2, %v311_v28  ;;  %s2563_s27 = sshll.u32 %s3357_s26, 6 }
  0x3c   : > { %v819_v32 = vld [vmem:[#allocation2 + $0x2c] sm:$0xf] }
  0x3d   : > { %v594_v36 = vld [vmem:[#allocation2 + $0x2c] sm:$0xf] }
  0x3e   : > { %v817_v31 = vld [vmem:[#allocation2 + $0x20] sm:$0xf]  ;;  %v735_v47 = vld [vmem:[#allocation2 + $0x2c] sm:$0xf] }
  0x3f   : > { %838 = vrot.lane.b32.xlu2 %v817_v31, %s3219_s24  ;;  %v592_v35 = vld [vmem:[#allocation2 + $0x20] sm:$0xf]  ;;  %v489_v16 = vld [vmem:[#allocation2 + $0x2c] sm:$0xf] }
  0x40   : > { %v813_v33 = vld [vmem:[#allocation2 + $0x8] sm:$0xf]  ;;  %v733_v46 = vld [vmem:[#allocation2 + $0x20] sm:$0xf]  ;;  %v651_v18 = vld [vmem:[#allocation2 + $0x2c] sm:$0xf] }
  0x41   : > { %v588_v37 = vld [vmem:[#allocation2 + $0x8] sm:$0xf]  ;;  %v649_v0 = vld [vmem:[#allocation2 + $0x20] sm:$0xf] }
  0x42   : > { %652 = vrot.lane.b32.xlu0 %v405_v30, %s3222_s28  ;;  %406 = vrot.lane.b32.xlu1 %v405_v30, %s3223_s6  ;;  %v815_v34 = vld [vmem:[#allocation2 + $0x14] sm:$0xf]  ;;  %v729_v1 = vld [vmem:[#allocation2 + $0x8] sm:$0xf]  ;;  %v487_v26 = vld [vmem:[#allocation2 + $0x20] sm:$0xf] }
  0x43   : > { %v590_v38 = vld [vmem:[#allocation2 + $0x14] sm:$0xf]  ;;  %v645_v2 = vld [vmem:[#allocation2 + $0x8] sm:$0xf] }
  0x44   : > { %v731_v48 = vld [vmem:[#allocation2 + $0x14] sm:$0xf]  ;;  %v483_v31 = vld [vmem:[#allocation2 + $0x8] sm:$0xf] }
  0x45   : > { %v647_v17 = vld [vmem:[#allocation2 + $0x14] sm:$0xf] }
  0x46   : > { %v485_v25 = vld [vmem:[#allocation2 + $0x14] sm:$0xf] }
  0x47   : > { %828 = vrot.lane.b32.xlu2 %v3419_v29, %s3219_s24 }
  0x4a   : > { %842 = vrot.lane.b32.xlu1 %v819_v32, %s3219_s24  ;;  %840 = vrot.lane.b32.xlu0 %v3402_v21, %s3219_s24 }
  0x4f   : > { %834 = vrot.lane.b32.xlu2 %v815_v34, %s3219_s24 }
  0x52   : > { %832 = vrot.lane.b32.xlu1 %v3411_v27, %s3219_s24  ;;  %830 = vrot.lane.b32.xlu0 %v813_v33, %s3219_s24 }
  0x57   : > { %615 = vrot.lane.b32.xlu2 %v3402_v21, %s3225_s10 }
  0x5a   : > { %1157 = vrot.lane.b32.xlu1 %v405_v30, %s3224_s8  ;;  %611 = vrot.lane.b32.xlu0 %v3377_v9, %s3225_s10 }
  0x5f   : > { %603 = vrot.lane.b32.xlu2 %v3419_v29, %s3225_s10 }
  0x62   : > { %613 = vrot.lane.b32.xlu1 %v592_v35, %s3225_s10  ;;  %617 = vrot.lane.b32.xlu0 %v594_v36, %s3225_s10 }
  0x67   : > { %609 = vrot.lane.b32.xlu2 %v590_v38, %s3225_s10 }
  0x6a   : > { %607 = vrot.lane.b32.xlu1 %v3411_v27, %s3225_s10  ;;  %605 = vrot.lane.b32.xlu0 %v588_v37, %s3225_s10 }
  0x8e   : > { %v837_v58 = vpop.permute.xlu2 %836 }
  0x8f   : > { %v848_v11 = vrot.slane %v837_v58, 4 }
  0x99   : > { %v839_v12 = vpop.permute.xlu2 %838 }
  0x9a   : > { %v849_v13 = vrot.slane %v839_v12, 4 }
  0x9c   : > { %v857_v19 = vsel %vm4284_vm4, %v848_v11, %v849_v13 }
  0x9d   : > { %v858_v20 = vsel %vm4282_vm5, %v837_v58, %v857_v19 }
  0x9e   : > { %867 = vst [vmem:[#allocation4 + $0x70] sm:$0xff] %v858_v20 }
  0xa1   : > { %v829_v34 = vpop.permute.xlu2 %828 }
  0xa5   : > { %v2630_v12 = vld [vmem:[#allocation4 + $0x70] sm:$0xf] }
  0xac   : > { %v3447_v39 = vpop.permute.xlu0 %736  ;;  %v3449_v40 = vpop.permute.xlu1 %491 }
  0xad   : > { %v3458_v43 = vrot.slane %v3447_v39, 4  ;;  %v3479_v54 = vrot.slane %v3449_v40, 4 }
  0xaf   : > { %v748_v44 = vunpack.c.l.b16 %v3458_v43  ;;  %v749_v45 = vunpack.c.h.b16 %v3458_v43  ;;  %v503_v62 = vunpack.c.l.b16 %v3479_v54  ;;  %v504_v63 = vunpack.c.h.b16 %v3479_v54 }
  0xb1   : > { %vm752_vm7 = vcmp.ne.s32.totalorder %v748_v44, %v3452_v41  ;;  %vm753_vm8 = vcmp.ne.s32.totalorder %v749_v45, %v3455_v42  ;;  %vm507_vm0 = vcmp.ne.s32.totalorder %v503_v62, %v3452_v41  ;;  %vm508_vm1 = vcmp.ne.s32.totalorder %v504_v63, %v3455_v42  ;;  %v401_v44 = vld [vmem:[#allocation2 + $0x20] sm:$0xf]  ;;  %v403_v45 = vld [vmem:[#allocation2 + $0x2c] sm:$0xf] }
  0xb2   : > { %vm3464_vm9 = vmpackc.low %vm753_vm8, %vm752_vm7  ;;  %vm4283_vm7 = vcmask 261120  }
  0xb3   : > { %v760_v50 = vsel %vm3464_vm9, %v733_v46, 0  ;;  %v762_v51 = vsel %vm3464_vm9, %v735_v47, 0  ;;  %v758_v52 = vsel %vm3464_vm9, %v731_v48, 0  ;;  %v756_v7 = vsel %vm3464_vm9, %v729_v1, 0  ;;  %vm3512_vm6 = vmpackc.low %vm508_vm1, %vm507_vm0  ;;  %v397_v48 = vld [vmem:[#allocation2 + $0x8] sm:$0xf] }
  0xb4   : > { %v3474_v53 = vpop.permute.xlu0 %652  ;;  %781 = vrot.lane.b32.xlu1 %v760_v50, %s3226_s11  ;;  %785 = vrot.lane.b32.xlu0 %v762_v51, %s3226_s11  ;;  %v407_v55 = vpop.permute.xlu1 %406  ;;  %v517_v22 = vsel %vm3512_vm6, %v489_v16, 0  ;;  %v513_v32 = vsel %vm3512_vm6, %v485_v25, 0  ;;  %v515_v33 = vsel %vm3512_vm6, %v487_v26, 0  ;;  %v511_v35 = vsel %vm3512_vm6, %v483_v31, 0 }
  0xb5   : > { %v3482_v56 = vrot.slane %v3474_v53, 4  ;;  %777 = vrot.lane.b32.xlu2 %v758_v52, %s3226_s11  ;;  %v408_v57 = vrot.slane %v407_v55, 4  ;;  %v740_v36 = vsel %vm4283_vm7, %v3458_v43, %v3447_v39  ;;  %vm494_vm1 = vcmask 130048  }
  0xb6   : > { %v741_v51 = vunpack.c.l.b16 %v740_v36  ;;  %v742_v52 = vunpack.c.h.b16 %v740_v36 }
  0xb7   : > { %v664_v59 = vunpack.c.l.b16 %v3482_v56  ;;  %v665_v60 = vunpack.c.h.b16 %v3482_v56  ;;  %v410_v61 = vsel %vm409_vm10, %v408_v57, %v407_v55  ;;  %v418_v28 = vunpack.c.l.b16 %v408_v57 }
  0xb8   : > { %v411_v3 = vunpack.c.l.b16 %v410_v61  ;;  %v412_v4 = vunpack.c.h.b16 %v410_v61  ;;  %v419_v30 = vunpack.c.h.b16 %v408_v57  ;;  %v844_v61 = vrot.slane %v829_v34, 4 }
  0xb9   : > { %vm668_vm11 = vcmp.ne.s32.totalorder %v664_v59, %v3452_v41  ;;  %vm669_vm12 = vcmp.ne.s32.totalorder %v665_v60, %v3455_v42  ;;  %vm422_vm8 = vcmp.ne.s32.totalorder %v418_v28, %v3452_v41  ;;  %v835_v59 = vpop.permute.xlu2 %834 }
  0xba   : > { %vm3491_vm13 = vmpackc.low %vm669_vm12, %vm668_vm11  ;;  %vm415_vm14 = vcmp.ne.s32.totalorder %v411_v3, %v3452_v41  ;;  %vm416_vm15 = vcmp.ne.s32.totalorder %v412_v4, %v3455_v42  ;;  %vm423_vm10 = vcmp.ne.s32.totalorder %v419_v30, %v3455_v42  ;;  %vm655_vm12 = vcmask 146432  }
  0xbb   : > { %v676_v6 = vsel %vm3491_vm13, %v649_v0, 0  ;;  %v672_v8 = vsel %vm3491_vm13, %v645_v2, 0  ;;  %vm3507_vm2 = vmpackc.low %vm416_vm15, %vm415_vm14  ;;  %v674_v23 = vsel %vm3491_vm13, %v647_v17, 0  ;;  %v678_v24 = vsel %vm3491_vm13, %v651_v18, 0  ;;  %v2947_v18 = vld [vmem:[#allocation4 + $0x74] sm:$0xf] }
  0xbc   : > { %697 = vrot.lane.b32.xlu1 %v676_v6, %s3227_s15  ;;  %773 = vrot.lane.b32.xlu0 %v756_v7, %s3226_s11  ;;  %v843_v37 = vpop.permute.xlu1 %842  ;;  %vm3541_vm11 = vmpackc.low %vm423_vm10, %vm422_vm8  ;;  %v841_v47 = vpop.permute.xlu0 %840  ;;  %vm745_vm14 = vcmp.ne.s32.totalorder %v741_v51, %v3452_v41  ;;  %vm746_vm15 = vcmp.ne.s32.totalorder %v742_v52, %v3455_v42  ;;  %v847_v60 = vrot.slane %v835_v59, 4  ;;  %v656_v63 = vsel %vm655_vm12, %v3482_v56, %v3474_v53 }
  0xbd   : > { %689 = vrot.lane.b32.xlu2 %v672_v8, %s3227_s15  ;;  %v851_v46 = vrot.slane %v843_v37, 4  ;;  %v850_v50 = vrot.slane %v841_v47, 4  ;;  %v430_v55 = vsel %vm3541_vm11, %v401_v44, 0  ;;  %v432_v39 = vsel %vm3541_vm11, %v403_v45, 0  ;;  %vm3560_vm0 = vmpackc.low %vm746_vm15, %vm745_vm14 }
  0xbe   : > { %v426_v57 = vsel %vm3541_vm11, %v397_v48, 0  ;;  %v657_v6 = vunpack.c.l.b16 %v656_v63  ;;  %v658_v7 = vunpack.c.h.b16 %v656_v63  ;;  %v757_v53 = vsel %vm3560_vm0, %v3411_v27, 0 }
  0xbf   : > { %v859_v43 = vsel %vm4284_vm4, %v850_v50, %v851_v46  ;;  %v759_v16 = vsel %vm3560_vm0, %v3377_v9, 0  ;;  %v761_v20 = vsel %vm3560_vm0, %v3402_v21, 0  ;;  %vm1160_vm12 = vcmask 277504   ;;  %v2300_v46 = vld [vmem:[%s4280_s4 + $0x8] sm:$0xff] }
  0xc0   : > { %v860_v58 = vsel %vm4282_vm5, %v841_v47, %v859_v43  ;;  %vm661_vm8 = vcmp.ne.s32.totalorder %v657_v6, %v3452_v41  ;;  %vm662_vm10 = vcmp.ne.s32.totalorder %v658_v7, %v3455_v42  ;;  %v4323_v44 = vmov 0 }
  0xc1   : > { %868 = vst [vmem:[#allocation4 + $0x78] sm:$0xff] %v860_v58  ;;  %vm3585_vm14 = vmpackc.low %vm662_vm10, %vm661_vm8  ;;  %v616_v30 = vpop.permute.xlu2 %615  ;;  %v755_v45 = vsel %vm3560_vm0, %v3419_v29, 0 }
  0xc2   : > { %v625_v48 = vrot.slane %v616_v30, 4 }
  0xc4   : > { %693 = vrot.lane.b32.xlu1 %v674_v23, %s3227_s15  ;;  %701 = vrot.lane.b32.xlu0 %v678_v24, %s3227_s15  ;;  %v833_v62 = vpop.permute.xlu1 %832  ;;  %v831_v1 = vpop.permute.xlu0 %830  ;;  %v495_v24 = vsel %vm494_vm1, %v3479_v54, %v3449_v40  ;;  %v675_v40 = vsel %vm3585_vm14, %v3377_v9, 0  ;;  %v671_v54 = vsel %vm3585_vm14, %v3419_v29, 0 }
  0xc5   : > { %540 = vrot.lane.b32.xlu2 %v517_v22, %s3228_s17  ;;  %v846_v0 = vrot.slane %v833_v62, 4  ;;  %v845_v3 = vrot.slane %v831_v1, 4 }
  0xc7   : > { %v855_v4 = vsel %vm4284_vm4, %v846_v0, %v847_v60  ;;  %v852_v11 = vsel %vm4284_vm4, %v844_v61, %v845_v3  ;;  %v677_v3 = vsel %vm3585_vm14, %v3402_v21, 0 }
  0xc8   : > { %v856_v8 = vsel %vm4282_vm5, %v833_v62, %v855_v4  ;;  %v854_v56 = vsel %vm4282_vm5, %v829_v34, %v852_v11  ;;  %v2948_v13 = vld [vmem:[#allocation4 + $0x74] sm:$0xf0]  ;;  %v2632_v19 = vld [vmem:[#allocation4 + $0x78] sm:$0xf0]  ;;  %v496_v34 = vunpack.c.l.b16 %v495_v24 }
  0xc9   : > { %866 = vst [vmem:[#allocation4 + $0x68] sm:$0xff] %v856_v8  ;;  %v2631_v17 = vor.u32 %v2948_v13, %v2630_v12  ;;  %v2635_v22 = vor.u32 %v2947_v18, %v2632_v19  ;;  %v604_v58 = vpop.permute.xlu2 %603 }
  0xca   : > { %865 = vst [vmem:[#allocation4 + $0x60] sm:$0xff] %v854_v56  ;;  %vm500_vm7 = vcmp.ne.s32.totalorder %v496_v34, %v3452_v41 }
  0xcb   : > { %981 = vmatpush.bf16.msra.mxu0 %v2631_v17  ;;  %1000 = vmatpush.bf16.msra.mxu1 %v2635_v22 }
  0xcc   : > { %532 = vrot.lane.b32.xlu1 %v513_v32, %s3228_s17  ;;  %536 = vrot.lane.b32.xlu0 %v515_v33, %s3228_s17  ;;  %v1158_v23 = vpop.permute.xlu1 %1157  ;;  %v612_v26 = vpop.permute.xlu0 %611 }
  0xcd   : > { %528 = vrot.lane.b32.xlu2 %v511_v35, %s3228_s17  ;;  %v1159_v25 = vrot.slane %v1158_v23, 4  ;;  %v497_v35 = vunpack.c.h.b16 %v495_v24  ;;  %v623_v47 = vrot.slane %v612_v26, 4  ;;  %v425_v24 = vsel %vm3507_vm2, %v3419_v29, 0 }
  0xcf   : > { %v1161_v31 = vsel %vm1160_vm12, %v1159_v25, %v1158_v23  ;;  %v1169_v32 = vunpack.c.l.b16 %v1159_v25  ;;  %v1170_v33 = vunpack.c.h.b16 %v1159_v25  ;;  %v429_v23 = vsel %vm3507_vm2, %v3377_v9, 0 }
  0xd0   : > { %v1162_v36 = vunpack.c.l.b16 %v1161_v31  ;;  %v1163_v37 = vunpack.c.h.b16 %v1161_v31  ;;  %v2946_v61 = vld [vmem:[#allocation4 + $0x64] sm:$0xf0]  ;;  %v2624_v1 = vld [vmem:[#allocation4 + $0x68] sm:$0xf0]  ;;  %v431_v25 = vsel %vm3507_vm2, %v3402_v21, 0 }
  0xd1   : > { %vm1173_vm15 = vcmp.ne.s32.totalorder %v1169_v32, %v3452_v41  ;;  %vm1174_vm5 = vcmp.ne.s32.totalorder %v1170_v33, %v3455_v42  ;;  %v2622_v60 = vld [vmem:[#allocation4 + $0x60] sm:$0xf]  ;;  %v2945_v0 = vld [vmem:[#allocation4 + $0x64] sm:$0xf]  ;;  %v610_v11 = vpop.permute.xlu2 %609  ;;  %v343_v32 = vld [vmem:[#allocation2 + $0x20] sm:$0xf] }
  0xd2   : > { %vm1166_vm1 = vcmp.ne.s32.totalorder %v1162_v36, %v3452_v41  ;;  %vm1167_vm8 = vcmp.ne.s32.totalorder %v1163_v37, %v3455_v42  ;;  %vm3599_vm10 = vmpackc.low %vm1174_vm5, %vm1173_vm15  ;;  %vm501_vm5 = vcmp.ne.s32.totalorder %v497_v35, %v3455_v42  ;;  %vm4285_vm15 = vcmask 908288   ;;  %v345_v33 = vld [vmem:[#allocation2 + $0x2c] sm:$0xf]  ;;  %v339_v35 = vld [vmem:[#allocation2 + $0x8] sm:$0xf] }
  0xd3   : > { %v4324_v44 = vsel %vm3599_vm10, 4294967295, %v4323_v44  ;;  %vm3608_vm12 = vmpackc.low %vm1167_vm8, %vm1166_vm1  ;;  %vm4329_vm1 = vcmask 1043456   ;;  %v673_v42 = vsel %vm3585_vm14, %v3411_v27, 0  ;;  %v2623_v63 = vor.u32 %v2946_v61, %v2622_v60  ;;  %v1154_v37 = vld [vmem:[#allocation2 + $0x20] sm:$0xf] }
  0xd4   : > { %451 = vrot.lane.b32.xlu1 %v430_v55, %s3229_s23  ;;  %455 = vrot.lane.b32.xlu0 %v432_v39, %s3229_s23  ;;  %v614_v50 = vpop.permute.xlu1 %613  ;;  %v618_v52 = vpop.permute.xlu0 %617  ;;  %vm3615_vm4 = vmpackc.low %vm501_vm5, %vm500_vm7  ;;  %v2627_v4 = vor.u32 %v2945_v0, %v2624_v1  ;;  %v622_v56 = vrot.slane %v610_v11, 4 }
  0xd5   : > { %443 = vrot.lane.b32.xlu2 %v426_v57, %s3229_s23  ;;  %v624_v51 = vrot.slane %v614_v50, 4  ;;  %v626_v55 = vrot.slane %v618_v52, 4  ;;  %vm4330_vm8 = vmmov %vm4329_vm1  ;;  %v516_v62 = vsel %vm3615_vm4, %v3402_v21, 0  ;;  %982 = vmatpush.bf16.msra.mxu0 %v2623_v63  ;;  %v512_v6 = vsel %vm3615_vm4, %v3411_v27, 0 }
  0xd6   : > { %1001 = vmatpush.bf16.msra.mxu1 %v2627_v4  ;;  %v510_v7 = vsel %vm3615_vm4, %v3419_v29, 0  ;;  %v514_v8 = vsel %vm3615_vm4, %v3377_v9, 0  ;;  %vm4331_vm7 = vmmov %vm4329_vm1 }
  0xd7   : > { %v632_v43 = vsel %vm4329_vm1, %v623_v47, %v624_v51  ;;  %v634_v41 = vsel %vm4330_vm8, %v625_v48, %v626_v55  ;;  %vm4332_vm5 = vmmov %vm4329_vm1  ;;  %v1156_v48 = vld [vmem:[#allocation2 + $0x2c] sm:$0xf]  ;;  %v1176_v51 = vsel %vm3608_vm12, %v3419_v29, 0  ;;  %vm4286_vm1 = vcmask 785408  }
  0xd8   : > { %v633_v57 = vsel %vm4285_vm15, %v612_v26, %v632_v43  ;;  %v635_v59 = vsel %vm4285_vm15, %v616_v30, %v634_v41  ;;  %v399_v26 = vld [vmem:[#allocation2 + $0x14] sm:$0xf]  ;;  %v427_v30 = vsel %vm3507_vm2, %v3411_v27, 0  ;;  %v1183_v50 = vsel %vm3599_vm10, %v1156_v48, 0  ;;  %vm4333_vm8 = vmmov %vm4332_vm5 }
  0xd9   : > { %642 = vst [vmem:[#allocation4 + $0x10] sm:$0xff] %v633_v57  ;;  %v428_v31 = vsel %vm3541_vm11, %v399_v26, 0  ;;  %v1150_v57 = vld [vmem:[#allocation2 + $0x8] sm:$0xf]  ;;  %v1152_v41 = vld [vmem:[#allocation2 + $0x14] sm:$0xf] }
  0xda   : > { %643 = vst [vmem:[#allocation4 + $0x18] sm:$0xff] %v635_v59 }
  0xdc   : > { %775 = vrot.lane.b32.xlu1 %v757_v53, %s3226_s11  ;;  %779 = vrot.lane.b32.xlu0 %v759_v16, %s3226_s11  ;;  %v619_v53 = vrot.slane %v604_v58, 4  ;;  %v608_v12 = vpop.permute.xlu1 %607  ;;  %v606_v13 = vpop.permute.xlu0 %605 }
  0xdd   : > { %783 = vrot.lane.b32.xlu2 %v761_v20, %s3226_s11  ;;  %v621_v16 = vrot.slane %v608_v12, 4  ;;  %v620_v17 = vrot.slane %v606_v13, 4 }
  0xdf   : > { %v630_v18 = vsel %vm4331_vm7, %v621_v16, %v622_v56  ;;  %v627_v19 = vsel %vm4332_vm5, %v619_v53, %v620_v17  ;;  %vm4334_vm7 = vmmov %vm4332_vm5  ;;  %vm4289_vm5 = vcmask 900096  }
  0xe0   : > { %v631_v20 = vsel %vm4285_vm15, %v608_v12, %v630_v18  ;;  %v629_v22 = vsel %vm4285_vm15, %v604_v58, %v627_v19 }
  0xe1   : > { %641 = vst [vmem:[#allocation4 + $0x8] sm:$0xff] %v631_v20 }
  0xe2   : > { %640 = vst [vmem:[#allocation4] sm:$0xff] %v629_v22 }
  0xe4   : > { %695 = vrot.lane.b32.xlu0 %v675_v40, %s3227_s15  ;;  %687 = vrot.lane.b32.xlu1 %v671_v54, %s3227_s15  ;;  %v341_v40 = vld [vmem:[#allocation2 + $0x14] sm:$0xf]  ;;  %v1180_v54 = vsel %vm3608_vm12, %v3377_v9, 0 }
  0xe5   : > { %771 = vrot.lane.b32.xlu2 %v755_v45, %s3226_s11  ;;  %v1181_v45 = vsel %vm3599_vm10, %v1154_v37, 0 }
  0xec   : > { %691 = vrot.lane.b32.xlu0 %v673_v42, %s3227_s15  ;;  %538 = vrot.lane.b32.xlu1 %v516_v62, %s3228_s17  ;;  %v1177_v42 = vsel %vm3599_vm10, %v1150_v57, 0 }
  0xed   : > { %699 = vrot.lane.b32.xlu2 %v677_v3, %s3227_s15 }
  0xf4   : > { %530 = vrot.lane.b32.xlu0 %v512_v6, %s3228_s17  ;;  %526 = vrot.lane.b32.xlu1 %v510_v7, %s3228_s17 }
  0xf5   : > { %534 = vrot.lane.b32.xlu2 %v514_v8, %s3228_s17 }
  0xfc   : > { %449 = vrot.lane.b32.xlu0 %v429_v23, %s3229_s23  ;;  %441 = vrot.lane.b32.xlu1 %v425_v24, %s3229_s23 }
  0xfd   : > { %453 = vrot.lane.b32.xlu2 %v431_v25, %s3229_s23 }
 0x104   : > { %445 = vrot.lane.b32.xlu0 %v427_v30, %s3229_s23  ;;  %447 = vrot.lane.b32.xlu1 %v428_v31, %s3229_s23 }
 0x105   : > { %362 = vrot.lane.b32.xlu2 %v3377_v9, %s3230_s14  ;;  %v1182_v9 = vsel %vm3608_vm12, %v3402_v21, 0 }
 0x10c   : > { %364 = vrot.lane.b32.xlu0 %v343_v32, %s3230_s14  ;;  %366 = vrot.lane.b32.xlu1 %v3402_v21, %s3230_s14  ;;  %v1178_v21 = vsel %vm3608_vm12, %v3411_v27, 0 }
 0x10d   : > { %368 = vrot.lane.b32.xlu2 %v345_v33, %s3230_s14 }
 0x10f   : > { %v3676_v34 = vpop.permute.xlu2 %777 }
 0x110   : > { %v790_v24 = vrot.slane %v3676_v34, 4 }
 0x114   : > { %356 = vrot.lane.b32.xlu1 %v339_v35, %s3230_s14  ;;  %354 = vrot.lane.b32.xlu0 %v3419_v29, %s3230_s14  ;;  %v1179_v29 = vsel %vm3599_vm10, %v1152_v41, 0  ;;  %vm4338_vm10 = vcmask 785408  }
 0x115   : > { %358 = vrot.lane.b32.xlu2 %v3411_v27, %s3230_s14 }
 0x117   : > { %v3683_v36 = vpop.permute.xlu2 %689 }
 0x11c   : > { %1200 = vrot.lane.b32.xlu1 %v1180_v54, %s4292_s16  ;;  %360 = vrot.lane.b32.xlu0 %v341_v40, %s3230_s14 }
 0x11d   : > { %1202 = vrot.lane.b32.xlu2 %v1181_v45, %s4292_s16 }
 0x11f   : > { %v3693_v47 = vpop.permute.xlu2 %540 }
 0x124   : > { %1206 = vrot.lane.b32.xlu1 %v1183_v50, %s4292_s16  ;;  %1204 = vrot.lane.b32.xlu0 %v1182_v9, %s4292_s16  ;;  %v704_v9 = vrot.slane %v3683_v36, 4 }
 0x125   : > { %1192 = vrot.lane.b32.xlu2 %v1176_v51, %s4292_s16 }
 0x126   : > { %v782_v52 = vpop.permute.xlu1 %781  ;;  %v786_v55 = vpop.permute.xlu0 %785 }
 0x127   : > { %v3706_v43 = vpop.permute.xlu2 %528  ;;  %v794_v63 = vrot.slane %v786_v55, 4  ;;  %v792_v25 = vrot.slane %v782_v52, 4 }
 0x12c   : > { %1196 = vrot.lane.b32.xlu1 %v1178_v21, %s4292_s16  ;;  %1194 = vrot.lane.b32.xlu0 %v1177_v42, %s4292_s16 }
 0x12d   : > { %1198 = vrot.lane.b32.xlu2 %v1179_v29, %s4292_s16  ;;  %s4224_s16 = scalar_lea.vmem [#allocation10], %s2563_s27 }
 0x12e   : > { %v698_v58 = vpop.permute.xlu1 %697  ;;  %v774_v59 = vpop.permute.xlu0 %773 }
 0x12f   : > { %v3718_v60 = vpop.permute.xlu2 %443  ;;  %v788_v8 = vrot.slane %v774_v59, 4  ;;  %v708_v51 = vrot.slane %v698_v58, 4 }
 0x136   : > { %v3720_v61 = vpop.permute.xlu1 %693  ;;  %v702_v62 = vpop.permute.xlu0 %701 }
 0x137   : > { %v784_v27 = vpop.permute.xlu2 %783  ;;  %v710_v17 = vrot.slane %v702_v62, 4 }
 0x138   : > { %v793_v0 = vrot.slane %v784_v27, 4 }
 0x13a   : > { %v802_v1 = vsel %vm4333_vm8, %v793_v0, %v794_v63  ;;  %vm4335_vm8 = vmmov %vm4334_vm7 }
 0x13b   : > { %v803_v3 = vsel %vm4286_vm1, %v784_v27, %v802_v1  ;;  %vm4336_vm15 = vmmov %vm4335_vm8 }
 0x13c   : > { %811 = vst [vmem:[#allocation4 + $0x58] sm:$0xff] %v803_v3 }
 0x13e   : > { %v3724_v4 = vpop.permute.xlu1 %532  ;;  %v537_v6 = vpop.permute.xlu0 %536 }
 0x13f   : > { %v772_v7 = vpop.permute.xlu2 %771  ;;  %v547_v32 = vrot.slane %v537_v6, 4 }
 0x140   : > { %v787_v11 = vrot.slane %v772_v7, 4 }
 0x142   : > { %v795_v53 = vsel %vm4334_vm7, %v787_v11, %v788_v8  ;;  %vm4290_vm7 = vcmask 916480   ;;  %v549_v11 = vrot.slane %v3693_v47, 4 }
 0x143   : > { %v797_v56 = vsel %vm4286_vm1, %v772_v7, %v795_v53  ;;  %vm4337_vm1 = vmmov %vm4335_vm8  ;;  %v2944_v63 = vld [vmem:[#allocation4 + $0x54] sm:$0xf0]  ;;  %v2616_v0 = vld [vmem:[#allocation4 + $0x58] sm:$0xf0]  ;;  %v706_v53 = vrot.slane %v3720_v61, 4 }
 0x144   : > { %808 = vst [vmem:[#allocation4 + $0x40] sm:$0xff] %v797_v56 }
 0x146   : > { %v3728_v12 = vpop.permute.xlu1 %451  ;;  %v456_v13 = vpop.permute.xlu0 %455 }
 0x147   : > { %v700_v16 = vpop.permute.xlu2 %699  ;;  %v464_v41 = vrot.slane %v456_v13, 4 }
 0x148   : > { %v709_v18 = vrot.slane %v700_v16, 4 }
 0x14a   : > { %v718_v19 = vsel %vm4335_vm8, %v709_v18, %v710_v17  ;;  %vm4339_vm8 = vmmov %vm4338_vm10 }
 0x14b   : > { %v719_v20 = vsel %vm4289_vm5, %v700_v16, %v718_v19  ;;  %vm4340_vm5 = vmmov %vm4337_vm1  ;;  %v2606_v18 = vld [vmem:[#allocation4 + $0x40] sm:$0xf]  ;;  %v2941_v19 = vld [vmem:[#allocation4 + $0x44] sm:$0xf] }
 0x14c   : > { %727 = vst [vmem:[#allocation4 + $0x38] sm:$0xff] %v719_v20 }
 0x14e   : > { %v776_v22 = vpop.permute.xlu1 %775  ;;  %v780_v23 = vpop.permute.xlu0 %779 }
 0x14f   : > { %v789_v26 = vrot.slane %v776_v22, 4  ;;  %v791_v30 = vrot.slane %v780_v23, 4  ;;  %v535_v31 = vpop.permute.xlu2 %534 }
 0x150   : > { %v546_v33 = vrot.slane %v535_v31, 4 }
 0x151   : > { %v798_v35 = vsel %vm4336_vm15, %v789_v26, %v790_v24  ;;  %v800_v37 = vsel %vm4337_vm1, %v791_v30, %v792_v25  ;;  %vm466_vm15 = vcmask 1031168  }
 0x152   : > { %v799_v40 = vsel %vm4338_vm10, %v776_v22, %v798_v35  ;;  %v801_v54 = vsel %vm4339_vm8, %v780_v23, %v800_v37  ;;  %v555_v45 = vsel %vm4340_vm5, %v546_v33, %v547_v32  ;;  %vm4341_vm10 = vmmov %vm4337_vm1  ;;  %vm4342_vm5 = vcmask 900096  }
 0x153   : > { %809 = vst [vmem:[#allocation4 + $0x48] sm:$0xff] %v799_v40  ;;  %v556_v34 = vsel %vm4290_vm7, %v535_v31, %v555_v45  ;;  %vm4343_vm8 = vmmov %vm4342_vm5  ;;  %v2940_v25 = vld [vmem:[#allocation4 + $0x34] sm:$0xf0]  ;;  %v2600_v31 = vld [vmem:[#allocation4 + $0x38] sm:$0xf0]  ;;  %v543_v40 = vrot.slane %v3706_v43, 4 }
 0x154   : > { %810 = vst [vmem:[#allocation4 + $0x50] sm:$0xff] %v801_v54  ;;  %vm4344_vm7 = vmmov %vm4337_vm1  ;;  %v545_v54 = vrot.slane %v3724_v4, 4 }
 0x155   : > { %565 = vst [vmem:[#allocation3 + $0x70] sm:$0xff] %v556_v34 }
 0x156   : > { %v696_v48 = vpop.permute.xlu0 %695  ;;  %v688_v50 = vpop.permute.xlu1 %687 }
 0x157   : > { %v707_v52 = vrot.slane %v696_v48, 4  ;;  %v703_v55 = vrot.slane %v688_v50, 4  ;;  %v454_v57 = vpop.permute.xlu2 %453 }
 0x158   : > { %v463_v21 = vrot.slane %v454_v57, 4 }
 0x159   : > { %v716_v42 = vsel %vm4341_vm10, %v707_v52, %v708_v51  ;;  %v711_v29 = vsel %vm4337_vm1, %v703_v55, %v704_v9  ;;  %vm4346_vm10 = vmmov %vm4337_vm1 }
 0x15a   : > { %v717_v59 = vsel %vm4342_vm5, %v696_v48, %v716_v42  ;;  %v713_v62 = vsel %vm4343_vm8, %v688_v50, %v711_v29  ;;  %v472_v27 = vsel %vm4344_vm7, %v463_v21, %v464_v41  ;;  %v2942_v7 = vld [vmem:[#allocation4 + $0x44] sm:$0xf0]  ;;  %v2608_v8 = vld [vmem:[#allocation4 + $0x48] sm:$0xf0]  ;;  %vm4345_vm7 = vmmov %vm4337_vm1 }
 0x15b   : > { %726 = vst [vmem:[#allocation4 + $0x30] sm:$0xff] %v717_v59  ;;  %v473_v36 = vsel %vm466_vm15, %v454_v57, %v472_v27  ;;  %v2614_v58 = vld [vmem:[#allocation4 + $0x50] sm:$0xf]  ;;  %v2943_v1 = vld [vmem:[#allocation4 + $0x54] sm:$0xf]  ;;  %v2607_v20 = vor.u32 %v2942_v7, %v2606_v18  ;;  %v2611_v22 = vor.u32 %v2941_v19, %v2608_v8  ;;  %vm4347_vm1 = vmmov %vm4342_vm5  ;;  %vm4348_vm5 = vcmask 916480  }
 0x15c   : > { %724 = vst [vmem:[#allocation4 + $0x20] sm:$0xff] %v713_v62  ;;  %v2615_v3 = vor.u32 %v2944_v63, %v2614_v58  ;;  %v2619_v6 = vor.u32 %v2943_v1, %v2616_v0  ;;  %vm4349_vm8 = vmmov %vm4345_vm7  ;;  %v2702_v52 = vld [vmem:[#allocation3 + $0x70] sm:$0xf]  ;;  %v2929_v55 = vld [vmem:[#allocation3 + $0x74] sm:$0xf] }
 0x15d   : > { %481 = vst [vmem:[#allocation3 + $0x58] sm:$0xff] %v473_v36  ;;  %v2582_v57 = vld [vmem:[#allocation4 + $0x10] sm:$0xf]  ;;  %v2936_v41 = vld [vmem:[#allocation4 + $0x14] sm:$0xf0] }
 0x15e   : > { %983 = vmatpush.bf16.msra.mxu0 %v2615_v3  ;;  %1002 = vmatpush.bf16.msra.mxu1 %v2619_v6  ;;  %v692_v56 = vpop.permute.xlu0 %691  ;;  %v539_v13 = vpop.permute.xlu1 %538  ;;  %v2935_v21 = vld [vmem:[#allocation4 + $0x14] sm:$0xf]  ;;  %v2584_v42 = vld [vmem:[#allocation4 + $0x18] sm:$0xf0]  ;;  %v327_v3 = vld [vmem:[#allocation2 + $0x18] sm:$0xff] }
 0x15f   : > { %v705_v16 = vrot.slane %v692_v56, 4  ;;  %v548_v17 = vrot.slane %v539_v13, 4  ;;  %v3754_v48 = vpop.permute.xlu2 %362  ;;  %v332_v6 = vsel %vm3382_vm3, %v327_v3, 0  ;;  %v2934_v18 = vld [vmem:[#allocation4 + $0x4] sm:$0xf0] }
 0x160   : > { %336 = vst [vmem:[#allocation3 + $0x10] sm:$0xff] %v332_v6  ;;  %v2574_v19 = vld [vmem:[#allocation4] sm:$0xf]  ;;  %v374_v3 = vrot.slane %v3754_v48, 4 }
 0x161   : > { %v714_v23 = vsel %vm4345_vm7, %v705_v16, %v706_v53  ;;  %v557_v24 = vsel %vm4346_vm10, %v548_v17, %v549_v11  ;;  %vm4350_vm10 = vmmov %vm4348_vm5  ;;  %v2583_v11 = vor.u32 %v2936_v41, %v2582_v57  ;;  %v2587_v53 = vor.u32 %v2935_v21, %v2584_v42 }
 0x162   : > { %v715_v26 = vsel %vm4347_vm1, %v692_v56, %v714_v23  ;;  %v558_v47 = vsel %vm4348_vm5, %v539_v13, %v557_v24  ;;  %984 = vmatpush.bf16.msra.mxu0 %v2607_v20  ;;  %1003 = vmatpush.bf16.msra.mxu1 %v2611_v22  ;;  %v2598_v61 = vld [vmem:[#allocation4 + $0x30] sm:$0xf]  ;;  %v2939_v30 = vld [vmem:[#allocation4 + $0x34] sm:$0xf]  ;;  %vm4351_vm1 = vmmov %vm4348_vm5  ;;  %v458_v56 = vrot.slane %v3718_v60, 4  ;;  %v462_v13 = vrot.slane %v3728_v12, 4 }
 0x163   : > { %725 = vst [vmem:[#allocation4 + $0x28] sm:$0xff] %v715_v26  ;;  %v2599_v32 = vor.u32 %v2940_v25, %v2598_v61  ;;  %v2603_v33 = vor.u32 %v2939_v30, %v2600_v31  ;;  %v2590_v51 = vld [vmem:[#allocation4 + $0x20] sm:$0xf]  ;;  %v2937_v59 = vld [vmem:[#allocation4 + $0x24] sm:$0xf]  ;;  %vm4352_vm5 = vmmov %vm4345_vm7  ;;  %v2575_v31 = vor.u32 %v2934_v18, %v2574_v19 }
 0x164   : > { %566 = vst [vmem:[#allocation3 + $0x78] sm:$0xff] %v558_v47  ;;  %v2933_v20 = vld [vmem:[#allocation4 + $0x4] sm:$0xf]  ;;  %v2576_v22 = vld [vmem:[#allocation4 + $0x8] sm:$0xf0] }
 0x165   : > { %v2566_v25 = vld [vmem:[%s4277_s1 + $0x4] sm:$0xf]  ;;  %v2931_v60 = vld [vmem:[%s4277_s1 + $0xc] sm:$0xf0]  ;;  %v2926_v57 = vld [vmem:[#allocation3 + $0x54] sm:$0xf0] }
 0x166   : > { %985 = vmatpush.bf16.msra.mxu0 %v2599_v32  ;;  %1004 = vmatpush.bf16.msra.mxu1 %v2603_v33  ;;  %v531_v35 = vpop.permute.xlu0 %530  ;;  %v527_v37 = vpop.permute.xlu1 %526  ;;  %v2579_v32 = vor.u32 %v2933_v20, %v2576_v22 }
 0x167   : > { %v544_v45 = vrot.slane %v531_v35, 4  ;;  %v542_v34 = vrot.slane %v527_v37, 4  ;;  %v369_v30 = vpop.permute.xlu2 %368 }
 0x169   : > { %v553_v50 = vsel %vm4349_vm8, %v544_v45, %v545_v54  ;;  %v550_v9 = vsel %vm4345_vm7, %v542_v34, %v543_v40  ;;  %vm4353_vm8 = vmmov %vm4352_vm5  ;;  %v2567_v54 = vor.u32 %v2931_v60, %v2566_v25  ;;  %v328_v45 = vld [vmem:[#allocation2 + $0x24] sm:$0xff] }
 0x16a   : > { %v554_v29 = vsel %vm4350_vm10, %v531_v35, %v553_v50  ;;  %v552_v43 = vsel %vm4351_vm1, %v527_v37, %v550_v9  ;;  %v2938_v4 = vld [vmem:[#allocation4 + $0x24] sm:$0xf0]  ;;  %v2592_v62 = vld [vmem:[#allocation4 + $0x28] sm:$0xf0]  ;;  %v333_v34 = vsel %vm3382_vm3, %v328_v45, 0  ;;  %vm4354_vm7 = vmmov %vm4352_vm5  ;;  %vm4295_vm10 = vcmask 1039360  }
 0x16b   : > { %564 = vst [vmem:[#allocation3 + $0x68] sm:$0xff] %v554_v29  ;;  %v2591_v27 = vor.u32 %v2938_v4, %v2590_v51  ;;  %v2595_v63 = vor.u32 %v2937_v59, %v2592_v62  ;;  %v2930_v0 = vld [vmem:[#allocation3 + $0x74] sm:$0xf0]  ;;  %v2704_v36 = vld [vmem:[#allocation3 + $0x78] sm:$0xf0]  ;;  %v325_v59 = vld [vmem:[#allocation2] sm:$0xff] }
 0x16c   : > { %563 = vst [vmem:[#allocation3 + $0x60] sm:$0xff] %v552_v43  ;;  %v2703_v58 = vor.u32 %v2930_v0, %v2702_v52  ;;  %v2707_v1 = vor.u32 %v2929_v55, %v2704_v36  ;;  %v2688_v29 = vld [vmem:[#allocation3 + $0x58] sm:$0xf0]  ;;  %v330_v0 = vsel %vm3382_vm3, %v325_v59, 0  ;;  %vm4355_vm1 = vmmov %vm4352_vm5 }
 0x16d   : > { %986 = vmatpush.bf16.msra.mxu0 %v2591_v27  ;;  %1005 = vmatpush.bf16.msra.mxu1 %v2595_v63  ;;  %337 = vst [vmem:[#allocation3 + $0x18] sm:$0xff] %v333_v34  ;;  %v326_v62 = vld [vmem:[#allocation2 + $0xc] sm:$0xff]  ;;  %v377_v27 = vrot.slane %v369_v30, 4 }
 0x16e   : > { %1111 = vmatpush.bf16.msra.mxu2 %v2703_v58  ;;  %1130 = vmatpush.bf16.msra.mxu3 %v2707_v1  ;;  %v450_v7 = vpop.permute.xlu0 %449  ;;  %v442_v8 = vpop.permute.xlu1 %441  ;;  %v331_v36 = vsel %vm3382_vm3, %v326_v62, 0  ;;  %334 = vst [vmem:[#allocation3] sm:$0xff] %v330_v0  ;;  %v1327_v0 = vld [vmem:[%s4278_s2 + $0x18] sm:$0xff] }
 0x16f   : > { %v461_v16 = vrot.slane %v450_v7, 4  ;;  %v457_v17 = vrot.slane %v442_v8, 4  ;;  %v359_v63 = vpop.permute.xlu2 %358  ;;  %335 = vst [vmem:[#allocation3 + $0x8] sm:$0xff] %v331_v36  ;;  %1345 = vperm.xlu1 %3079, %v1327_v0   ;;  %v2950_v0 = vld [vmem:[%s4277_s1 + $0x28] sm:$0xf0] }
 0x170   : > { %v372_v45 = vrot.slane %v359_v63, 4 }
 0x171   : > { %v470_v23 = vsel %vm4352_vm5, %v461_v16, %v462_v13  ;;  %v465_v24 = vsel %vm4353_vm8, %v457_v17, %v458_v56  ;;  %987 = vmatpush.bf16.msra.mxu0 %v2583_v11  ;;  %1006 = vmatpush.bf16.msra.mxu1 %v2587_v53  ;;  %vm4356_vm5 = vmmov %vm4355_vm1  ;;  %v2570_v56 = vld [vmem:[%s4277_s1 + $0x1c] sm:$0xf]  ;;  %v2932_v13 = vld [vmem:[%s4277_s1 + $0x24] sm:$0xf0] }
 0x172   : > { %v471_v12 = vsel %vm466_vm15, %v450_v7, %v470_v23  ;;  %v467_v26 = vsel %vm466_vm15, %v442_v8, %v465_v24  ;;  %v2928_v47 = vld [vmem:[#allocation3 + $0x64] sm:$0xf0]  ;;  %v2696_v61 = vld [vmem:[#allocation3 + $0x68] sm:$0xf0]  ;;  %v2571_v24 = vor.u32 %v2932_v13, %v2570_v56  ;;  %vm4357_vm8 = vmmov %vm4355_vm1 }
 0x173   : > { %480 = vst [vmem:[#allocation3 + $0x50] sm:$0xff] %v471_v12  ;;  %v2694_v33 = vld [vmem:[#allocation3 + $0x60] sm:$0xf]  ;;  %v2927_v35 = vld [vmem:[#allocation3 + $0x64] sm:$0xf] }
 0x174   : > { %478 = vst [vmem:[#allocation3 + $0x40] sm:$0xff] %v467_v26  ;;  %v2695_v37 = vor.u32 %v2928_v47, %v2694_v33  ;;  %v2699_v40 = vor.u32 %v2927_v35, %v2696_v61  ;;  %v2918_v62 = vld [vmem:[#allocation3 + $0x14] sm:$0xf0] }
 0x175   : > { %988 = vmatpush.bf16.msra.mxu0 %v2575_v31  ;;  %1007 = vmatpush.bf16.msra.mxu1 %v2579_v32  ;;  %v2646_v13 = vld [vmem:[#allocation3] sm:$0xf] }
 0x176   : > { %1112 = vmatpush.bf16.msra.mxu2 %v2695_v37  ;;  %1131 = vmatpush.bf16.msra.mxu3 %v2699_v40  ;;  %v446_v50 = vpop.permute.xlu0 %445  ;;  %v448_v9 = vpop.permute.xlu1 %447 }
 0x177   : > { %v459_v51 = vrot.slane %v446_v50, 4  ;;  %v460_v52 = vrot.slane %v448_v9, 4  ;;  %v1203_v47 = vpop.permute.xlu2 %1202 }
 0x178   : > { %989 = vmatmul.bf16.vlgmr.msra.gmra.mxu0 %v2567_v54  ;;  %1008 = vmatmul.bf16.vlgmr.msra.gmra.mxu1 %v2567_v54  ;;  %v1213_v34 = vrot.slane %v1203_v47, 4  ;;  %v2913_v47 = vld [vmem:[%s4277_s1 + $0x8] sm:$0xf0] }
 0x179   : > { %v468_v55 = vsel %vm4354_vm7, %v459_v51, %v460_v52  ;;  %vm4294_vm7 = vcmask 769024  }
 0x17a   : > { %v469_v41 = vsel %vm466_vm15, %v446_v50, %v468_v55  ;;  %v2686_v21 = vld [vmem:[#allocation3 + $0x50] sm:$0xf]  ;;  %v2925_v42 = vld [vmem:[#allocation3 + $0x54] sm:$0xf] }
 0x17b   : > { %479 = vst [vmem:[#allocation3 + $0x48] sm:$0xff] %v469_v41  ;;  %v2687_v43 = vor.u32 %v2926_v57, %v2686_v21  ;;  %v2691_v4 = vor.u32 %v2925_v42, %v2688_v29  ;;  %v2678_v53 = vld [vmem:[#allocation3 + $0x40] sm:$0xf]  ;;  %v2923_v19 = vld [vmem:[#allocation3 + $0x44] sm:$0xf] }
 0x17c   : > { %v2654_v55 = vld [vmem:[#allocation3 + $0x10] sm:$0xf]  ;;  %v2917_v57 = vld [vmem:[#allocation3 + $0x14] sm:$0xf] }
 0x17d   : > { %1113 = vmatpush.bf16.msra.mxu2 %v2687_v43  ;;  %1132 = vmatpush.bf16.msra.mxu3 %v2691_v4 }
 0x17e   : > { %v365_v58 = vpop.permute.xlu0 %364  ;;  %v367_v1 = vpop.permute.xlu1 %366 }
 0x17f   : > { %v375_v6 = vrot.slane %v365_v58, 4  ;;  %v376_v7 = vrot.slane %v367_v1, 4  ;;  %v1193_v41 = vpop.permute.xlu2 %1192 }
 0x181   : > { %v384_v8 = vsel %vm4355_vm1, %v374_v3, %v375_v6  ;;  %v386_v11 = vsel %vm4356_vm5, %v376_v7, %v377_v27  ;;  %vm4358_vm5 = vmmov %vm4355_vm1  ;;  %v2656_v27 = vld [vmem:[#allocation3 + $0x18] sm:$0xf0] }
 0x182   : > { %v385_v16 = vsel %vm4295_vm10, %v3754_v48, %v384_v8  ;;  %v387_v17 = vsel %vm4295_vm10, %v367_v1, %v386_v11  ;;  %v2924_v18 = vld [vmem:[#allocation3 + $0x44] sm:$0xf0]  ;;  %v2680_v20 = vld [vmem:[#allocation3 + $0x48] sm:$0xf0]  ;;  %v2659_v56 = vor.u32 %v2917_v57, %v2656_v27  ;;  %v2949_v57 = vld [vmem:[%s4277_s1 + $0x10] sm:$0xf0] }
 0x183   : > { %394 = vst [vmem:[#allocation3 + $0x30] sm:$0xff] %v385_v16  ;;  %v2679_v22 = vor.u32 %v2924_v18, %v2678_v53  ;;  %v2683_v23 = vor.u32 %v2923_v19, %v2680_v20  ;;  %v2655_v53 = vor.u32 %v2918_v62, %v2654_v55  ;;  %v2916_v16 = vld [vmem:[#allocation3 + $0x4] sm:$0xf0]  ;;  %v2915_v19 = vld [vmem:[#allocation3 + $0x4] sm:$0xf] }
 0x184   : > { %395 = vst [vmem:[#allocation3 + $0x38] sm:$0xff] %v387_v17  ;;  %v2648_v20 = vld [vmem:[#allocation3 + $0x8] sm:$0xf0]  ;;  %v2714_v27 = vld [vmem:[%s4277_s1 + $0x20] sm:$0xf] }
 0x185   : > { %1114 = vmatpush.bf16.msra.mxu2 %v2679_v22  ;;  %1133 = vmatpush.bf16.msra.mxu3 %v2683_v23  ;;  %v1208_v22 = vrot.slane %v1193_v41, 4 }
 0x186   : > { %v357_v25 = vpop.permute.xlu1 %356  ;;  %v355_v60 = vpop.permute.xlu0 %354 }
 0x187   : > { %v371_v12 = vrot.slane %v357_v25, 4  ;;  %v370_v26 = vrot.slane %v355_v60, 4  ;;  %v1199_v11 = vpop.permute.xlu2 %1198 }
 0x188   : > { %994 = vmatmul.bf16.gmra.mxu0 %v2571_v24  ;;  %1013 = vmatmul.bf16.gmra.mxu1 %v2571_v24  ;;  %v1211_v23 = vrot.slane %v1199_v11, 4 }
 0x189   : > { %v379_v48 = vsel %vm4357_vm8, %v370_v26, %v371_v12  ;;  %vm4359_vm8 = vmmov %vm4355_vm1  ;;  %v2638_v26 = vld [vmem:[%s4277_s1] sm:$0xf] }
 0x18a   : > { %v381_v61 = vsel %vm4295_vm10, %v355_v60, %v379_v48  ;;  %v2670_v30 = vld [vmem:[#allocation3 + $0x30] sm:$0xf]  ;;  %v2921_v31 = vld [vmem:[#allocation3 + $0x34] sm:$0xf]  ;;  %v2647_v60 = vor.u32 %v2916_v16, %v2646_v13 }
 0x18b   : > { %392 = vst [vmem:[#allocation3 + $0x20] sm:$0xff] %v381_v61  ;;  %v2922_v32 = vld [vmem:[#allocation3 + $0x34] sm:$0xf0]  ;;  %v2672_v33 = vld [vmem:[#allocation3 + $0x38] sm:$0xf0] }
 0x18c   : > { %v2671_v35 = vor.u32 %v2922_v32, %v2670_v30  ;;  %v2675_v37 = vor.u32 %v2921_v31, %v2672_v33  ;;  %v2651_v30 = vor.u32 %v2915_v19, %v2648_v20  ;;  %v1325_v31 = vld [vmem:[%s4278_s2 + $0x8] sm:$0xff]  ;;  %v1326_v32 = vld [vmem:[%s4278_s2 + $0x10] sm:$0xff]  ;;  %v1324_v33 = vld [vmem:[%s4278_s2] sm:$0xff] }
 0x18d   : > { %1335 = vperm.xlu1 %3079, %v1325_v31   ;;  %1340 = vperm.xlu0 %3078, %v1326_v32  }
 0x18e   : > { %1115 = vmatpush.bf16.msra.mxu2 %v2671_v35  ;;  %1134 = vmatpush.bf16.msra.mxu3 %v2675_v37  ;;  %v1201_v40 = vpop.permute.xlu1 %1200  ;;  %v361_v54 = vpop.permute.xlu0 %360 }
 0x18f   : > { %v1212_v50 = vrot.slane %v1201_v40, 4  ;;  %v373_v9 = vrot.slane %v361_v54, 4  ;;  %1330 = vperm.xlu2 %3080, %v1324_v33  }
 0x191   : > { %v1221_v51 = vsel %vm4355_vm1, %v1212_v50, %v1213_v34  ;;  %v382_v52 = vsel %vm4358_vm5, %v372_v45, %v373_v9  ;;  %vm4360_vm5 = vmmov %vm4355_vm1  ;;  %v2639_v9 = vor.u32 %v2913_v47, %v2638_v26 }
 0x192   : > { %v1222_v21 = vsel %vm4294_vm7, %v1201_v40, %v1221_v51  ;;  %v383_v42 = vsel %vm4295_vm10, %v359_v63, %v382_v52  ;;  %v2662_v58 = vld [vmem:[#allocation3 + $0x20] sm:$0xf]  ;;  %v2919_v63 = vld [vmem:[#allocation3 + $0x24] sm:$0xf]  ;;  %v2710_v51 = vld [vmem:[%s4277_s1 + $0x8] sm:$0xf] }
 0x193   : > { %393 = vst [vmem:[#allocation3 + $0x28] sm:$0xff] %v383_v42 }
 0x194   : > { %1231 = vst [vmem:[#allocation3 + $0x10] sm:$0xff] %v1222_v21 }
 0x196   : > { %v1207_v29 = vpop.permute.xlu1 %1206  ;;  %v1205_v43 = vpop.permute.xlu0 %1204 }
 0x197   : > { %v1215_v4 = vrot.slane %v1207_v29, 4  ;;  %v1214_v59 = vrot.slane %v1205_v43, 4 }
 0x199   : > { %v1223_v36 = vsel %vm4359_vm8, %v1214_v59, %v1215_v4  ;;  %vm4361_vm8 = vcmask 261120   ;;  %v2642_v4 = vld [vmem:[%s4277_s1 + $0x18] sm:$0xf]  ;;  %v2914_v59 = vld [vmem:[%s4277_s1 + $0x20] sm:$0xf0] }
 0x19a   : > { %v1224_v1 = vsel %vm4294_vm7, %v1205_v43, %v1223_v36  ;;  %v2920_v3 = vld [vmem:[#allocation3 + $0x24] sm:$0xf0]  ;;  %v2664_v6 = vld [vmem:[#allocation3 + $0x28] sm:$0xf0]  ;;  %v2711_v43 = vor.u32 %v2949_v57, %v2710_v51  ;;  %v2643_v62 = vor.u32 %v2914_v59, %v2642_v4  ;;  %v2715_v36 = vor.u32 %v2950_v0, %v2714_v27 }
 0x19b   : > { %v2663_v7 = vor.u32 %v2920_v3, %v2662_v58  ;;  %v2667_v8 = vor.u32 %v2919_v63, %v2664_v6  ;;  %1232 = vst [vmem:[#allocation3 + $0x18] sm:$0xff] %v1224_v1  ;;  %v2726_v12 = vld [vmem:[#allocation3 + $0x10] sm:$0xf]  ;;  %v2953_v54 = vld [vmem:[#allocation3 + $0x14] sm:$0xf] }
 0x19d   : > { %1116 = vmatpush.bf16.msra.mxu2 %v2663_v7  ;;  %1135 = vmatpush.bf16.msra.mxu3 %v2667_v8 }
 0x19e   : > { %v1197_v17 = vpop.permute.xlu1 %1196  ;;  %v1195_v18 = vpop.permute.xlu0 %1194 }
 0x19f   : > { %v1210_v24 = vrot.slane %v1197_v17, 4  ;;  %v1209_v25 = vrot.slane %v1195_v18, 4 }
 0x1a1   : > { %v1219_v48 = vsel %vm4355_vm1, %v1210_v24, %v1211_v23  ;;  %v1216_v61 = vsel %vm4360_vm5, %v1208_v22, %v1209_v25  ;;  %1117 = vmatpush.bf16.msra.mxu2 %v2655_v53  ;;  %1136 = vmatpush.bf16.msra.mxu3 %v2659_v56  ;;  %vm4362_vm1 = vmmov %vm4361_vm8 }
 0x1a2   : > { %v1220_v35 = vsel %vm4294_vm7, %v1197_v17, %v1219_v48  ;;  %v1218_v37 = vsel %vm4294_vm7, %v1193_v41, %v1216_v61  ;;  %v2954_v40 = vld [vmem:[#allocation3 + $0x14] sm:$0xf0]  ;;  %v2728_v45 = vld [vmem:[#allocation3 + $0x18] sm:$0xf0]  ;;  %vm4363_vm5 = vmmov %vm4362_vm1  ;;  %vm1401_vm7 = vcmask 134144  }
 0x1a3   : > { %1229 = vst [vmem:[#allocation3] sm:$0xff] %v1218_v37  ;;  %v2727_v34 = vor.u32 %v2954_v40, %v2726_v12  ;;  %v2731_v50 = vor.u32 %v2953_v54, %v2728_v45 }
 0x1a4   : > { %1230 = vst [vmem:[#allocation3 + $0x8] sm:$0xff] %v1220_v35 }
 0x1a5   : > { %1118 = vmatpush.bf16.msra.mxu2 %v2647_v60  ;;  %1137 = vmatpush.bf16.msra.mxu3 %v2651_v30 }
 0x1a6   : > { %1284 = vmatpush.bf16.msrb.mxu0 %v2727_v34  ;;  %1303 = vmatpush.bf16.msrb.mxu1 %v2731_v50 }
 0x1a8   : > { %1119 = vmatmul.bf16.vlgmr.msra.gmra.mxu2 %v2639_v9  ;;  %1138 = vmatmul.bf16.vlgmr.msra.gmra.mxu3 %v2639_v9 }
 0x1aa   : > { %v2718_v52 = vld [vmem:[#allocation3] sm:$0xf]  ;;  %v2951_v55 = vld [vmem:[#allocation3 + $0x4] sm:$0xf] }
 0x1ab   : > { %v2952_v41 = vld [vmem:[#allocation3 + $0x4] sm:$0xf0]  ;;  %v2720_v21 = vld [vmem:[#allocation3 + $0x8] sm:$0xf0] }
 0x1ac   : > { %v2719_v42 = vor.u32 %v2952_v41, %v2718_v52  ;;  %v2723_v29 = vor.u32 %v2951_v55, %v2720_v21 }
 0x1ae   : > { %1285 = vmatpush.bf16.msrb.mxu0 %v2719_v42  ;;  %1304 = vmatpush.bf16.msrb.mxu1 %v2723_v29 }
 0x1b1   : > { %2732 = vmatmul.msk.bf16.vlgmr.msrb.gmra.mxu0 %vm4361_vm8, %v2711_v43  ;;  %2734 = vmatmul.msk.bf16.vlgmr.msrb.gmra.mxu1 %vm4362_vm1, %v2711_v43  ;;  %vm4364_vm8 = vmmov %vm4362_vm1  ;;  %vm1397_vm1 = vcmask 1043592  }
 0x1b8   : > { %1124 = vmatmul.bf16.gmra.mxu2 %v2643_v62  ;;  %1143 = vmatmul.bf16.gmra.mxu3 %v2643_v62 }
 0x1c1   : > { %2733 = vmatmul.msk.bf16.gmra.mxu0 %vm4363_vm5, %v2715_v36  ;;  %2735 = vmatmul.msk.bf16.gmra.mxu1 %vm4364_vm8, %v2715_v36  ;;  %vm1398_vm5 = vcmask 1047556   ;;  %vm1384_vm8 = vcmask 138240  }
 0x1c2   : > { %vm3850_vm10 = vmor %vm1398_vm5, %vm1397_vm1  ;;  %vm4377_vm5 = vcmask 916480  }
 0x1e1   : > { %v1346_v53 = vpop.permute.xlu1 %1345 }
 0x1e9   : > { %v1331_v18 = vpop.permute.xlu2 %1330 }
 0x1f5   : > { %v990_v58 = vpop.f32.mrf.mxu0  ;;  %v1009_v1 = vpop.f32.mrf.mxu1 }
 0x1fd   : > { %v992_v3 = vpop.f32.mrf.mxu0  ;;  %v1011_v63 = vpop.f32.mrf.mxu1 }
 0x1ff   : > { %v1336_v31 = vpop.permute.xlu1 %1335  ;;  %v1341_v57 = vpop.permute.xlu0 %1340 }
 0x205   : > { %v995_v6 = vpop.f32.mrf.mxu0  ;;  %v1014_v7 = vpop.f32.mrf.mxu1 }
 0x20d   : > { %v997_v8 = vpop.f32.mrf.mxu0  ;;  %v1016_v11 = vpop.f32.mrf.mxu1 }
 0x22b   : > { %v1120_v56 = vpop.f32.mrf.mxu2  ;;  %v1139_v13 = vpop.f32.mrf.mxu3 }
 0x22c   : > { %v1121_v16 = vadd.f32 %v1120_v56, %v990_v58  ;;  %v1140_v17 = vadd.f32 %v1139_v13, %v1009_v1 }
 0x22e   : > { %v1287_v19 = vpop.f32.mrf.mxu0  ;;  %v1306_v20 = vpop.f32.mrf.mxu1 }
 0x22f   : > { %v1316_v22 = vadd.f32 %v1287_v19, %v1121_v16  ;;  %v1317_v23 = vadd.f32 %v1306_v20, %v1140_v17 }
 0x231   : > { %v1348_v24 = vadd.f32 %v1331_v18, %v1316_v22  ;;  %v1349_v25 = vadd.f32 %v1331_v18, %v1317_v23 }
 0x233   : > { %v1356_v60 = vmax.f32 %v1348_v24, 0.0  ;;  %v1357_v12 = vmax.f32 %v1349_v25, 0.0  ;;  %v1122_v26 = vpop.f32.mrf.mxu2  ;;  %v1141_v47 = vpop.f32.mrf.mxu3 }
 0x234   : > { %v1123_v48 = vadd.f32 %v1122_v26, %v992_v3  ;;  %v1142_v61 = vadd.f32 %v1141_v47, %v1011_v63 }
 0x235   : > { %v1364_v30 = vpack.c.bf16 %v1357_v12, %v1356_v60 }
 0x236   : > { %v1289_v32 = vpop.f32.mrf.mxu0  ;;  %v1308_v33 = vpop.f32.mrf.mxu1 }
 0x237   : > { %v1318_v35 = vadd.f32 %v1289_v32, %v1123_v48  ;;  %v1319_v37 = vadd.f32 %v1308_v33, %v1142_v61  ;;  %1372 = vrot.lane.b32.xlu1 %v1364_v30, %s3232_s29 }
 0x239   : > { %v1350_v40 = vadd.f32 %v1336_v31, %v1318_v35  ;;  %v1351_v54 = vadd.f32 %v1336_v31, %v1319_v37 }
 0x23b   : > { %v1358_v45 = vmax.f32 %v1350_v40, 0.0  ;;  %v1359_v34 = vmax.f32 %v1351_v54, 0.0  ;;  %v1125_v50 = vpop.f32.mrf.mxu2  ;;  %v1144_v9 = vpop.f32.mrf.mxu3 }
 0x23c   : > { %v1126_v51 = vadd.f32 %v1125_v50, %v995_v6  ;;  %v1145_v52 = vadd.f32 %v1144_v9, %v1014_v7 }
 0x23d   : > { %v1365_v55 = vpack.c.bf16 %v1359_v34, %v1358_v45 }
 0x23e   : > { %v1292_v41 = vpop.f32.mrf.mxu0  ;;  %v1311_v21 = vpop.f32.mrf.mxu1 }
 0x23f   : > { %v1320_v42 = vadd.f32 %v1292_v41, %v1126_v51  ;;  %v1321_v29 = vadd.f32 %v1311_v21, %v1145_v52  ;;  %1374 = vrot.lane.b32.xlu2 %v1365_v55, %s3232_s29 }
 0x241   : > { %v1352_v43 = vadd.f32 %v1341_v57, %v1320_v42  ;;  %v1353_v4 = vadd.f32 %v1341_v57, %v1321_v29 }
 0x243   : > { %v1360_v59 = vmax.f32 %v1352_v43, 0.0  ;;  %v1361_v62 = vmax.f32 %v1353_v4, 0.0  ;;  %v1127_v27 = vpop.f32.mrf.mxu2  ;;  %v1146_v0 = vpop.f32.mrf.mxu3 }
 0x244   : > { %v1128_v36 = vadd.f32 %v1127_v27, %v997_v8  ;;  %v1147_v58 = vadd.f32 %v1146_v0, %v1016_v11 }
 0x245   : > { %v1366_v1 = vpack.c.bf16 %v1361_v62, %v1360_v59 }
 0x246   : > { %v1294_v3 = vpop.f32.mrf.mxu0  ;;  %v1313_v63 = vpop.f32.mrf.mxu1 }
 0x247   : > { %v1322_v6 = vadd.f32 %v1294_v3, %v1128_v36  ;;  %v1323_v7 = vadd.f32 %v1313_v63, %v1147_v58  ;;  %1376 = vrot.lane.b32.xlu2 %v1366_v1, %s3232_s29 }
 0x249   : > { %v1354_v56 = vadd.f32 %v1346_v53, %v1322_v6  ;;  %v1355_v13 = vadd.f32 %v1346_v53, %v1323_v7 }
 0x24b   : > { %v1362_v16 = vmax.f32 %v1354_v56, 0.0  ;;  %v1363_v17 = vmax.f32 %v1355_v13, 0.0 }
 0x24d   : > { %v1367_v18 = vpack.c.bf16 %v1363_v17, %v1362_v16 }
 0x24f   : > { %1378 = vrot.lane.b32.xlu0 %v1367_v18, %s3232_s29 }
 0x299   : > { %v1375_v19 = vpop.permute.xlu2 %1374 }
 0x29a   : > { %v1381_v8 = vrot.slane %v1375_v19, 4 }
 0x29c   : > { %v1386_v20 = vsel %vm1384_vm8, %v1381_v8, %v1375_v19  ;;  %1404 = vst.msk [vmem:[#allocation2 + $0x14] sm:$0xf] %vm1401_vm7, %v1381_v8 }
 0x29d   : > { %1403 = vst.msk [vmem:[#allocation2 + $0xc] sm:$0xff] %vm3850_vm10, %v1386_v20 }
 0x2a1   : > { %v1377_v53 = vpop.permute.xlu2 %1376 }
 0x2a2   : > { %v1382_v22 = vrot.slane %v1377_v53, 4 }
 0x2a3   : > { %v1684_v43 = vld [vmem:[#allocation2 + $0x14] sm:$0xf] }
 0x2a4   : > { %v1387_v23 = vsel %vm1384_vm8, %v1382_v22, %v1377_v53  ;;  %1406 = vst.msk [vmem:[#allocation2 + $0x20] sm:$0xf] %vm1401_vm7, %v1382_v22  ;;  %v3862_v24 = vld [vmem:[#allocation2 + $0xc] sm:$0xff]  ;;  %v1692_v4 = vsel %vm3491_vm13, %v1684_v43, 0  ;;  %v1812_v59 = vld [vmem:[#allocation2 + $0x14] sm:$0xf] }
 0x2a5   : > { %1405 = vst.msk [vmem:[#allocation2 + $0x18] sm:$0xff] %vm3850_vm10, %v1387_v23  ;;  %v1414_v25 = vsel %vm3382_vm3, %v3862_v24, 0  ;;  %v1748_v62 = vld [vmem:[#allocation2 + $0x14] sm:$0xf]  ;;  %v1755_v27 = vsel %vm3560_vm0, %v3862_v24, 0  ;;  %v1551_v36 = vsel %vm3615_vm4, %v3862_v24, 0 }
 0x2a6   : > { %1418 = vst [vmem:[#allocation3 + $0x8] sm:$0xff] %v1414_v25  ;;  %v1628_v14 = vld [vmem:[#allocation2 + $0x14] sm:$0xf]  ;;  %v1756_v0 = vsel %vm3464_vm9, %v1748_v62, 0  ;;  %v1691_v58 = vsel %vm3585_vm14, %v3862_v24, 0 }
 0x2a7   : > { %v1544_v3 = vld [vmem:[#allocation2 + $0x14] sm:$0xf] }
 0x2a8   : > { %v1552_v7 = vsel %vm3512_vm6, %v1544_v3, 0  ;;  %v1480_v15 = vld [vmem:[#allocation2 + $0x14] sm:$0xf] }
 0x2a9   : > { %v1373_v60 = vpop.permute.xlu1 %1372 }
 0x2aa   : > { %v1380_v12 = vrot.slane %v1373_v60, 4 }
 0x2ab   : > { %v1686_v1 = vld [vmem:[#allocation2 + $0x20] sm:$0xf] }
 0x2ac   : > { %v1385_v26 = vsel %vm1384_vm8, %v1380_v12, %v1373_v60  ;;  %1402 = vst.msk [vmem:[#allocation2 + $0x8] sm:$0xf] %vm1401_vm7, %v1380_v12  ;;  %v3871_v47 = vld [vmem:[#allocation2 + $0x18] sm:$0xff]  ;;  %v1694_v63 = vsel %vm3491_vm13, %v1686_v1, 0  ;;  %v1814_v6 = vld [vmem:[#allocation2 + $0x20] sm:$0xf] }
 0x2ad   : > { %1400 = vst.msk [vmem:[#allocation2] sm:$0xff] %vm3850_vm10, %v1385_v26  ;;  %v1415_v48 = vsel %vm3382_vm3, %v3871_v47, 0  ;;  %v1482_v56 = vld [vmem:[#allocation2 + $0x20] sm:$0xf]  ;;  %v1757_v18 = vsel %vm3560_vm0, %v3871_v47, 0  ;;  %v1693_v19 = vsel %vm3585_vm14, %v3871_v47, 0 }
 0x2ae   : > { %1419 = vst [vmem:[#allocation3 + $0x10] sm:$0xff] %v1415_v48  ;;  %v1490_v13 = vsel %vm3541_vm11, %v1482_v56, 0  ;;  %v1630_v16 = vld [vmem:[#allocation2 + $0x20] sm:$0xf]  ;;  %v1553_v11 = vsel %vm3615_vm4, %v3871_v47, 0  ;;  %v1489_v20 = vsel %vm3507_vm2, %v3871_v47, 0 }
 0x2af   : > { %v1750_v17 = vld [vmem:[#allocation2 + $0x20] sm:$0xf]  ;;  %v2157_v39 = vsel %vm3608_vm12, %v3871_v47, 0 }
 0x2b0   : > { %v1758_v8 = vsel %vm3464_vm9, %v1750_v17, 0  ;;  %v1546_v22 = vld [vmem:[#allocation2 + $0x20] sm:$0xf] }
 0x2b1   : > { %v1554_v25 = vsel %vm3512_vm6, %v1546_v22, 0 }
 0x2b3   : > { %v1810_v61 = vld [vmem:[#allocation2 + $0x8] sm:$0xf] }
 0x2b4   : > { %v1682_v30 = vld [vmem:[#allocation2 + $0x8] sm:$0xf]  ;;  %1827 = vrot.lane.b32.xlu2 %v1810_v61, %s3219_s24  ;;  %v3879_v32 = vld [vmem:[#allocation2] sm:$0xff] }
 0x2b5   : > { %v1690_v31 = vsel %vm3491_vm13, %v1682_v30, 0  ;;  %1825 = vrot.lane.b32.xlu1 %v3879_v32, %s3219_s24  ;;  %v1413_v33 = vsel %vm3382_vm3, %v3879_v32, 0  ;;  %v1478_v35 = vld [vmem:[#allocation2 + $0x8] sm:$0xf]  ;;  %v1689_v9 = vsel %vm3585_vm14, %v3879_v32, 0  ;;  %v1753_v52 = vsel %vm3560_vm0, %v3879_v32, 0 }
 0x2b6   : > { %1707 = vrot.lane.b32.xlu0 %v1690_v31, %s3227_s15  ;;  %v1746_v37 = vld [vmem:[#allocation2 + $0x8] sm:$0xf]  ;;  %1417 = vst [vmem:[#allocation3] sm:$0xff] %v1413_v33  ;;  %v1486_v54 = vsel %vm3541_vm11, %v1478_v35, 0  ;;  %v1485_v57 = vsel %vm3507_vm2, %v3879_v32, 0  ;;  %v1549_v21 = vsel %vm3615_vm4, %v3879_v32, 0 }
 0x2b7   : > { %v1626_v40 = vld [vmem:[#allocation2 + $0x8] sm:$0xf]  ;;  %v1754_v45 = vsel %vm3464_vm9, %v1746_v37, 0 }
 0x2b8   : > { %v1542_v55 = vld [vmem:[#allocation2 + $0x8] sm:$0xf] }
 0x2b9   : > { %v1550_v41 = vsel %vm3512_vm6, %v1542_v55, 0 }
 0x2bc   : > { %1643 = vrot.lane.b32.xlu2 %v1626_v40, %s3225_s10  ;;  %v1487_v40 = vsel %vm3507_vm2, %v3862_v24, 0 }
 0x2bd   : > { %1771 = vrot.lane.b32.xlu1 %v1754_v45, %s3226_s11 }
 0x2be   : > { %1503 = vrot.lane.b32.xlu0 %v1486_v54, %s3229_s23 }
 0x2c1   : > { %v1379_v34 = vpop.permute.xlu0 %1378 }
 0x2c2   : > { %v1383_v50 = vrot.slane %v1379_v34, 4 }
 0x2c4   : > { %v1388_v51 = vsel %vm1384_vm8, %v1383_v50, %v1379_v34  ;;  %1408 = vst.msk [vmem:[#allocation2 + $0x2c] sm:$0xf] %vm1401_vm7, %v1383_v50  ;;  %1705 = vrot.lane.b32.xlu2 %v1689_v9, %s3227_s15  ;;  %vm4375_vm7 = vcmask 908288  }
 0x2c5   : > { %1407 = vst.msk [vmem:[#allocation2 + $0x24] sm:$0xff] %vm3850_vm10, %v1388_v51  ;;  %1641 = vrot.lane.b32.xlu1 %v3879_v32, %s3225_s10  ;;  %vm4374_vm10 = vcmask 785408  }
 0x2c6   : > { %1769 = vrot.lane.b32.xlu0 %v1753_v52, %s3226_s11 }
 0x2cb   : > { %v1688_v53 = vld [vmem:[#allocation2 + $0x2c] sm:$0xf] }
 0x2cc   : > { %1501 = vrot.lane.b32.xlu2 %v1485_v57, %s3229_s23  ;;  %v3917_v42 = vld [vmem:[#allocation2 + $0x24] sm:$0xff]  ;;  %v1696_v23 = vsel %vm3491_vm13, %v1688_v53, 0  ;;  %v1752_v12 = vld [vmem:[#allocation2 + $0x2c] sm:$0xf]  ;;  %vm4369_vm13 = vcmask 900096  }
 0x2cd   : > { %1567 = vrot.lane.b32.xlu1 %v1550_v41, %s3228_s17  ;;  %v1416_v29 = vsel %vm3382_vm3, %v3917_v42, 0  ;;  %v1484_v26 = vld [vmem:[#allocation2 + $0x2c] sm:$0xf]  ;;  %v1760_v48 = vsel %vm3464_vm9, %v1752_v12, 0  ;;  %v1759_v31 = vsel %vm3560_vm0, %v3917_v42, 0  ;;  %vm4367_vm3 = vcmask 1043456  }
 0x2ce   : > { %1565 = vrot.lane.b32.xlu0 %v1549_v21, %s3228_s17  ;;  %1420 = vst [vmem:[#allocation3 + $0x18] sm:$0xff] %v1416_v29  ;;  %v1492_v61 = vsel %vm3541_vm11, %v1484_v26, 0  ;;  %v1816_v5 = vld [vmem:[#allocation2 + $0x2c] sm:$0xf]  ;;  %vm4368_vm9 = vmmov %vm4367_vm3  ;;  %v1488_v21 = vsel %vm3541_vm11, %v1480_v15, 0  ;;  %v1695_v43 = vsel %vm3585_vm14, %v3917_v42, 0 }
 0x2cf   : > { %v1632_v49 = vld [vmem:[#allocation2 + $0x2c] sm:$0xf]  ;;  %v1426_v29 = vld [vmem:[#allocation2 + $0x20] sm:$0xf]  ;;  %vm4371_vm11 = vmmov %vm4367_vm3  ;;  %v2155_v15 = vsel %vm3608_vm12, %v3862_v24, 0 }
 0x2d0   : > { %v1548_v35 = vld [vmem:[#allocation2 + $0x2c] sm:$0xf]  ;;  %vm4372_vm0 = vmmov %vm4367_vm3  ;;  %v1424_v26 = vld [vmem:[#allocation2 + $0x14] sm:$0xf] }
 0x2d1   : > { %v1556_v37 = vsel %vm3512_vm6, %v1548_v35, 0  ;;  %vm4370_vm6 = vcmask 777216   ;;  %v1428_v28 = vld [vmem:[#allocation2 + $0x2c] sm:$0xf]  ;;  %vm4373_vm14 = vmmov %vm4372_vm0 }
 0x2d2   : > { %vm4376_vm1 = vmmov %vm4372_vm0 }
 0x2d4   : > { %1711 = vrot.lane.b32.xlu2 %v1692_v4, %s3227_s15 }
 0x2d5   : > { %1831 = vrot.lane.b32.xlu1 %v1812_v59, %s3219_s24 }
 0x2d6   : > { %1829 = vrot.lane.b32.xlu0 %v3862_v24, %s3219_s24 }
 0x2dc   : > { %1773 = vrot.lane.b32.xlu2 %v1755_v27, %s3226_s11 }
 0x2dd   : > { %1647 = vrot.lane.b32.xlu1 %v1628_v14, %s3225_s10 }
 0x2de   : > { %1775 = vrot.lane.b32.xlu0 %v1756_v0, %s3226_s11 }
 0x2e4   : > { %1569 = vrot.lane.b32.xlu2 %v1551_v36, %s3228_s17 }
 0x2e5   : > { %1709 = vrot.lane.b32.xlu1 %v1691_v58, %s3227_s15 }
 0x2e6   : > { %1645 = vrot.lane.b32.xlu0 %v3862_v24, %s3225_s10 }
 0x2ec   : > { %1715 = vrot.lane.b32.xlu2 %v1694_v63, %s3227_s15 }
 0x2ed   : > { %1835 = vrot.lane.b32.xlu1 %v1814_v6, %s3219_s24 }
 0x2ee   : > { %1571 = vrot.lane.b32.xlu0 %v1552_v7, %s3228_s17 }
 0x2f4   : > { %1511 = vrot.lane.b32.xlu2 %v1490_v13, %s3229_s23 }
 0x2f5   : > { %1651 = vrot.lane.b32.xlu1 %v1630_v16, %s3225_s10 }
 0x2f6   : > { %1833 = vrot.lane.b32.xlu0 %v3871_v47, %s3219_s24 }
 0x2fc   : > { %1777 = vrot.lane.b32.xlu2 %v1757_v18, %s3226_s11  ;;  %v1422_v18 = vld [vmem:[#allocation2 + $0x8] sm:$0xf] }
 0x2fd   : > { %1713 = vrot.lane.b32.xlu1 %v1693_v19, %s3227_s15  ;;  %v1555_v19 = vsel %vm3615_vm4, %v3917_v42, 0  ;;  %vm4379_vm4 = vnez %v4324_v44  ;;  %v2302_v44 = vld [vmem:[%s4280_s4 + $0x18] sm:$0xff] }
 0x2fe   : > { %1779 = vrot.lane.b32.xlu0 %v1758_v8, %s3226_s11 }
 0x304   : > { %1573 = vrot.lane.b32.xlu2 %v1553_v11, %s3228_s17 }
 0x305   : > { %1509 = vrot.lane.b32.xlu1 %v1489_v20, %s3229_s23 }
 0x306   : > { %1649 = vrot.lane.b32.xlu0 %v3871_v47, %s3225_s10 }
 0x30c   : > { %1837 = vrot.lane.b32.xlu2 %v3917_v42, %s3219_s24 }
 0x30d   : > { %1719 = vrot.lane.b32.xlu1 %v1696_v23, %s3227_s15  ;;  %v2150_v23 = vld [vmem:[#allocation2 + $0x20] sm:$0xf] }
 0x30e   : > { %1575 = vrot.lane.b32.xlu0 %v1554_v25, %s3228_s17  ;;  %v1828_v60 = vpop.permute.xlu2 %1827  ;;  %v2158_v12 = vsel %vm4379_vm4, %v2150_v23, 0 }
 0x30f   : > { %v1842_v34 = vrot.slane %v1828_v60, 4 }
 0x314   : > { %1783 = vrot.lane.b32.xlu2 %v1760_v48, %s3226_s11 }
 0x315   : > { %1515 = vrot.lane.b32.xlu1 %v1492_v61, %s3229_s23 }
 0x316   : > { %1839 = vrot.lane.b32.xlu0 %v1816_v5, %s3219_s24  ;;  %v1644_v30 = vpop.permute.xlu2 %1643  ;;  %s4378_s24 = smov 94  }
 0x317   : > { %v1658_v3 = vrot.slane %v1644_v30, 4 }
 0x31c   : > { %1653 = vrot.lane.b32.xlu2 %v3917_v42, %s3225_s10 }
 0x31d   : > { %1781 = vrot.lane.b32.xlu1 %v1759_v31, %s3226_s11 }
 0x31e   : > { %1655 = vrot.lane.b32.xlu0 %v1632_v49, %s3225_s10  ;;  %v1706_v33 = vpop.permute.xlu2 %1705  ;;  %v2152_v49 = vld [vmem:[#allocation2 + $0x2c] sm:$0xf] }
 0x31f   : > { %v1721_v50 = vrot.slane %v1706_v33, 4  ;;  %v2160_v35 = vsel %vm4379_vm4, %v2152_v49, 0 }
 0x324   : > { %1579 = vrot.lane.b32.xlu2 %v1556_v37, %s3228_s17  ;;  %v1491_v37 = vsel %vm3507_vm2, %v3917_v42, 0  ;;  %vm4384_vm2 = vmmov %vm4372_vm0 }
 0x325   : > { %1505 = vrot.lane.b32.xlu1 %v1487_v40, %s3229_s23  ;;  %v2159_v40 = vsel %vm3608_vm12, %v3917_v42, 0 }
 0x326   : > { %1445 = vrot.lane.b32.xlu0 %v3871_v47, %s3230_s14  ;;  %v1502_v2 = vpop.permute.xlu2 %1501 }
 0x327   : > { %v1826_v45 = vpop.permute.xlu1 %1825  ;;  %v1517_v27 = vrot.slane %v1502_v2, 4 }
 0x328   : > { %v1708_v54 = vpop.permute.xlu0 %1707  ;;  %v1841_v51 = vrot.slane %v1826_v45, 4 }
 0x329   : > { %v1722_v9 = vrot.slane %v1708_v54, 4 }
 0x32a   : > { %v1849_v55 = vsel %vm4368_vm9, %v1841_v51, %v1842_v34  ;;  %vm4381_vm9 = vmmov %vm4370_vm6 }
 0x32b   : > { %v1729_v52 = vsel %vm4367_vm3, %v1721_v50, %v1722_v9  ;;  %v1850_v41 = vsel %vm4370_vm6, %v1826_v45, %v1849_v55  ;;  %vm4380_vm3 = vmmov %vm4372_vm0  ;;  %v2146_v9 = vld [vmem:[#allocation2 + $0x8] sm:$0xf] }
 0x32c   : > { %v1730_v57 = vsel %vm4369_vm13, %v1706_v33, %v1729_v52  ;;  %1507 = vrot.lane.b32.xlu2 %v1488_v21, %s3229_s23  ;;  %1861 = vst [vmem:[#allocation4 + $0x60] sm:$0xff] %v1850_v41  ;;  %vm4382_vm13 = vmmov %vm4372_vm0  ;;  %v2154_v52 = vsel %vm4379_vm4, %v2146_v9, 0 }
 0x32d   : > { %1741 = vst [vmem:[#allocation4 + $0x20] sm:$0xff] %v1730_v57  ;;  %1447 = vrot.lane.b32.xlu1 %v1426_v29, %s3230_s14  ;;  %vm4383_vm6 = vmmov %vm4374_vm10 }
 0x32e   : > { %1717 = vrot.lane.b32.xlu0 %v1695_v43, %s3227_s15  ;;  %v4025_v4 = vpop.permute.xlu2 %1711 }
 0x32f   : > { %v1772_v62 = vpop.permute.xlu1 %1771  ;;  %v1724_v21 = vrot.slane %v4025_v4, 4 }
 0x330   : > { %v1504_v59 = vpop.permute.xlu0 %1503  ;;  %v1786_v63 = vrot.slane %v1772_v62, 4 }
 0x331   : > { %v1518_v38 = vrot.slane %v1504_v59, 4 }
 0x333   : > { %v1525_v14 = vsel %vm4371_vm11, %v1517_v27, %v1518_v38  ;;  %v2299_v27 = vld [vmem:[%s4280_s4] sm:$0xff]  ;;  %vm4386_vm11 = vcmask 900096  }
 0x334   : > { %v1526_v0 = vsel %vm466_vm15, %v1502_v2, %v1525_v14  ;;  %1449 = vrot.lane.b32.xlu2 %v3917_v42, %s3230_s14  ;;  %v2153_v42 = vsel %vm3608_vm12, %v3879_v32, 0  ;;  %vm4385_vm12 = vmmov %vm4372_vm0 }
 0x335   : > { %1537 = vst [vmem:[#allocation3 + $0x40] sm:$0xff] %v1526_v0  ;;  %1437 = vrot.lane.b32.xlu1 %v3879_v32, %s3230_s14  ;;  %v2148_v32 = vld [vmem:[#allocation2 + $0x14] sm:$0xf] }
 0x336   : > { %1451 = vrot.lane.b32.xlu0 %v1428_v28, %s3230_s14  ;;  %v1774_v36 = vpop.permute.xlu2 %1773  ;;  %v2156_v14 = vsel %vm4379_vm4, %v2148_v32, 0  ;;  %vm4393_vm4 = vmmov %vm4384_vm2 }
 0x337   : > { %v1642_v1 = vpop.permute.xlu1 %1641  ;;  %v1787_v34 = vrot.slane %v1774_v36, 4 }
 0x338   : > { %v1770_v58 = vpop.permute.xlu0 %1769  ;;  %v1657_v7 = vrot.slane %v1642_v1, 4 }
 0x339   : > { %v1785_v6 = vrot.slane %v1770_v58, 4 }
 0x33a   : > { %v1665_v13 = vsel %vm4373_vm14, %v1657_v7, %v1658_v3  ;;  %vm4388_vm14 = vmmov %vm4376_vm1 }
 0x33b   : > { %v1793_v56 = vsel %vm4372_vm0, %v1785_v6, %v1786_v63  ;;  %v1666_v17 = vsel %vm4375_vm7, %v1642_v1, %v1665_v13  ;;  %vm4387_vm0 = vmmov %vm4375_vm7  ;;  %v2301_v63 = vld [vmem:[%s4280_s4 + $0x10] sm:$0xff] }
 0x33c   : > { %v1794_v16 = vsel %vm4374_vm10, %v1770_v58, %v1793_v56  ;;  %1439 = vrot.lane.b32.xlu2 %v1422_v18, %s3230_s14  ;;  %1677 = vst [vmem:[#allocation4] sm:$0xff] %v1666_v17  ;;  %vm4389_vm10 = vmmov %vm4377_vm5 }
 0x33d   : > { %1805 = vst [vmem:[#allocation4 + $0x40] sm:$0xff] %v1794_v16  ;;  %1577 = vrot.lane.b32.xlu1 %v1555_v19, %s3228_s17  ;;  %vm4390_vm7 = vmmov %vm4376_vm1 }
 0x33e   : > { %1441 = vrot.lane.b32.xlu0 %v3862_v24, %s3230_s14  ;;  %v4045_v8 = vpop.permute.xlu2 %1569 }
 0x33f   : > { %v1568_v11 = vpop.permute.xlu1 %1567  ;;  %v1583_v58 = vrot.slane %v4045_v8, 4 }
 0x340   : > { %v1566_v20 = vpop.permute.xlu0 %1565  ;;  %v1582_v53 = vrot.slane %v1568_v11, 4 }
 0x341   : > { %v1581_v22 = vrot.slane %v1566_v20, 4 }
 0x343   : > { %v1589_v25 = vsel %vm4376_vm1, %v1581_v22, %v1582_v53  ;;  %vm4391_vm1 = vmmov %vm4381_vm9 }
 0x344   : > { %v1590_v60 = vsel %vm4377_vm5, %v1566_v20, %v1589_v25  ;;  %2177 = vrot.lane.b32.xlu2 %v2157_v39, %s4378_s24  ;;  %vm4392_vm5 = vmmov %vm4384_vm2 }
 0x345   : > { %1601 = vst [vmem:[#allocation3 + $0x60] sm:$0xff] %v1590_v60  ;;  %1443 = vrot.lane.b32.xlu1 %v1424_v26, %s3230_s14  ;;  %s3161_s14 = scalar_lea.hbm %s4281_s5, 128 }
 0x346   : > { %2179 = vrot.lane.b32.xlu0 %v2158_v12, %s4378_s24  ;;  %v4057_v48 = vpop.permute.xlu2 %1715 }
 0x347   : > { %v1832_v61 = vpop.permute.xlu1 %1831  ;;  %v1726_v53 = vrot.slane %v4057_v48, 4 }
 0x348   : > { %v1830_v5 = vpop.permute.xlu0 %1829  ;;  %v1844_v30 = vrot.slane %v1832_v61, 4 }
 0x349   : > { %v1843_v31 = vrot.slane %v1830_v5, 4 }
 0x34b   : > { %v1851_v47 = vsel %vm4380_vm3, %v1843_v31, %v1844_v30  ;;  %vm4394_vm3 = vmmov %vm4386_vm11 }
 0x34c   : > { %v1852_v33 = vsel %vm4381_vm9, %v1830_v5, %v1851_v47  ;;  %2183 = vrot.lane.b32.xlu2 %v2160_v35, %s4378_s24  ;;  %vm4395_vm9 = vmmov %vm4383_vm6 }
 0x34d   : > { %1862 = vst [vmem:[#allocation4 + $0x68] sm:$0xff] %v1852_v33  ;;  %2181 = vrot.lane.b32.xlu1 %v2159_v40, %s4378_s24 }
 0x34e   : > { %1513 = vrot.lane.b32.xlu0 %v1491_v37, %s3229_s23  ;;  %v4072_v2 = vpop.permute.xlu2 %1511 }
 0x34f   : > { %v1648_v54 = vpop.permute.xlu1 %1647  ;;  %v1522_v30 = vrot.slane %v4072_v2, 4 }
 0x350   : > { %v1776_v45 = vpop.permute.xlu0 %1775  ;;  %v1660_v24 = vrot.slane %v1648_v54, 4 }
 0x351   : > { %v1788_v50 = vrot.slane %v1776_v45, 4 }
 0x353   : > { %v1795_v51 = vsel %vm4382_vm13, %v1787_v34, %v1788_v50  ;;  %vm4396_vm13 = vmmov %vm4384_vm2 }
 0x354   : > { %v1796_v10 = vsel %vm4383_vm6, %v1774_v36, %v1795_v51  ;;  %2173 = vrot.lane.b32.xlu2 %v2155_v15, %s4378_s24  ;;  %vm4397_vm6 = vmmov %vm4384_vm2 }
 0x355   : > { %1806 = vst [vmem:[#allocation4 + $0x48] sm:$0xff] %v1796_v10  ;;  %2171 = vrot.lane.b32.xlu1 %v2154_v52, %s4378_s24 }
 0x356   : > { %2169 = vrot.lane.b32.xlu0 %v2153_v42, %s4378_s24  ;;  %v1778_v55 = vpop.permute.xlu2 %1777 }
 0x357   : > { %v1710_v57 = vpop.permute.xlu1 %1709  ;;  %v1789_v22 = vrot.slane %v1778_v55, 4 }
 0x358   : > { %v1646_v41 = vpop.permute.xlu0 %1645  ;;  %v1723_v29 = vrot.slane %v1710_v57, 4 }
 0x359   : > { %v1659_v43 = vrot.slane %v1646_v41, 4 }
 0x35a   : > { %v1731_v59 = vsel %vm4384_vm2, %v1723_v29, %v1724_v21  ;;  %vm4398_vm2 = vmmov %vm4387_vm0 }
 0x35b   : > { %v1667_v62 = vsel %vm4385_vm12, %v1659_v43, %v1660_v24  ;;  %v1732_v38 = vsel %vm4386_vm11, %v1710_v57, %v1731_v59  ;;  %vm4399_vm12 = vmmov %vm4393_vm4 }
 0x35c   : > { %v1668_v4 = vsel %vm4387_vm0, %v1646_v41, %v1667_v62  ;;  %1742 = vst [vmem:[#allocation4 + $0x28] sm:$0xff] %v1732_v38  ;;  %2310 = vperm.xlu2 %3080, %v2300_v46   ;;  %vm4400_vm11 = vmmov %vm4389_vm10 }
 0x35d   : > { %1678 = vst [vmem:[#allocation4 + $0x8] sm:$0xff] %v1668_v4  ;;  %2305 = vperm.xlu1 %3079, %v2299_v27   ;;  %vm4401_vm0 = vmmov %vm4393_vm4 }
 0x35e   : > { %2175 = vrot.lane.b32.xlu0 %v2156_v14, %s4378_s24  ;;  %v1574_v0 = vpop.permute.xlu2 %1573 }
 0x35f   : > { %v1836_v28 = vpop.permute.xlu1 %1835  ;;  %v1585_v34 = vrot.slane %v1574_v0, 4 }
 0x360   : > { %v1572_v36 = vpop.permute.xlu0 %1571  ;;  %v1846_v13 = vrot.slane %v1836_v28, 4 }
 0x361   : > { %v1584_v1 = vrot.slane %v1572_v36, 4 }
 0x363   : > { %v1591_v3 = vsel %vm4388_vm14, %v1583_v58, %v1584_v1  ;;  %vm4402_vm14 = vmmov %vm4391_vm1  ;;  %v2988_v1 = vld [vmem:[#allocation4 + $0x64] sm:$0xf0] }
 0x364   : > { %v1592_v6 = vsel %vm4389_vm10, %v4045_v8, %v1591_v3  ;;  %vm4403_vm10 = vmmov %vm4401_vm0  ;;  %v2796_v3 = vld [vmem:[#allocation4 + $0x68] sm:$0xf0] }
 0x365   : > { %1602 = vst [vmem:[#allocation3 + $0x68] sm:$0xff] %v1592_v6  ;;  %2320 = vperm.xlu1 %3079, %v2302_v44   ;;  %v2794_v6 = vld [vmem:[#allocation4 + $0x60] sm:$0xf] }
 0x366   : > { %2315 = vperm.xlu0 %3078, %v2301_v63   ;;  %v1838_v16 = vpop.permute.xlu2 %1837 }
 0x367   : > { %v1652_v7 = vpop.permute.xlu1 %1651  ;;  %v1847_v42 = vrot.slane %v1838_v16, 4 }
 0x368   : > { %v1834_v56 = vpop.permute.xlu0 %1833  ;;  %v1662_v31 = vrot.slane %v1652_v7, 4  ;;  %v2987_v7 = vld [vmem:[#allocation4 + $0x64] sm:$0xf] }
 0x369   : > { %v1845_v17 = vrot.slane %v1834_v56, 4 }
 0x36b   : > { %v1853_v18 = vsel %vm4390_vm7, %v1845_v17, %v1846_v13  ;;  %vm4404_vm7 = vmmov %vm4401_vm0  ;;  %v2799_v17 = vor.u32 %v2987_v7, %v2796_v3 }
 0x36c   : > { %v1854_v19 = vsel %vm4391_vm1, %v1834_v56, %v1853_v18  ;;  %vm4405_vm1 = vmmov %vm4395_vm9 }
 0x36d   : > { %1863 = vst [vmem:[#allocation4 + $0x70] sm:$0xff] %v1854_v19 }
 0x36e   : > { %v1784_v25 = vpop.permute.xlu2 %1783 }
 0x36f   : > { %v1714_v11 = vpop.permute.xlu1 %1713  ;;  %v1792_v24 = vrot.slane %v1784_v25, 4 }
 0x370   : > { %v1780_v20 = vpop.permute.xlu0 %1779  ;;  %v1725_v23 = vrot.slane %v1714_v11, 4 }
 0x371   : > { %v1790_v8 = vrot.slane %v1780_v20, 4 }
 0x372   : > { %v1733_v60 = vsel %vm4392_vm5, %v1725_v23, %v1726_v53  ;;  %vm4406_vm5 = vmmov %vm4398_vm2 }
 0x373   : > { %v1797_v39 = vsel %vm4393_vm4, %v1789_v22, %v1790_v8  ;;  %v1734_v12 = vsel %vm4394_vm3, %v1714_v11, %v1733_v60  ;;  %vm4407_vm4 = vmmov %vm4401_vm0  ;;  %v2984_v60 = vld [vmem:[#allocation4 + $0x44] sm:$0xf0] }
 0x374   : > { %v1798_v26 = vsel %vm4395_vm9, %v1778_v55, %v1797_v39  ;;  %1743 = vst [vmem:[#allocation4 + $0x30] sm:$0xff] %v1734_v12  ;;  %v2802_v27 = vld [vmem:[#allocation4 + $0x70] sm:$0xf]  ;;  %v2780_v39 = vld [vmem:[#allocation4 + $0x48] sm:$0xf0]  ;;  %vm4408_vm3 = vmmov %vm4401_vm0 }
 0x375   : > { %1807 = vst [vmem:[#allocation4 + $0x50] sm:$0xff] %v1798_v26  ;;  %v2778_v12 = vld [vmem:[#allocation4 + $0x40] sm:$0xf]  ;;  %v2983_v26 = vld [vmem:[#allocation4 + $0x44] sm:$0xf]  ;;  %vm4409_vm9 = vmmov %vm4401_vm0 }
 0x376   : > { %v1654_v40 = vpop.permute.xlu2 %1653 }
 0x377   : > { %v1510_v61 = vpop.permute.xlu1 %1509  ;;  %v1663_v29 = vrot.slane %v1654_v40, 4 }
 0x378   : > { %v1650_v5 = vpop.permute.xlu0 %1649  ;;  %v1521_v48 = vrot.slane %v1510_v61, 4 }
 0x379   : > { %v1661_v49 = vrot.slane %v1650_v5, 4 }
 0x37a   : > { %v1529_v47 = vsel %vm4396_vm13, %v1521_v48, %v1522_v30  ;;  %v2779_v30 = vor.u32 %v2984_v60, %v2778_v12  ;;  %vm4410_vm13 = vcmask 1039360   ;;  %v2973_v60 = vld [vmem:[#allocation8 + $0xc] sm:$0xf0] }
 0x37b   : > { %v1669_v33 = vsel %vm4397_vm6, %v1661_v49, %v1662_v31  ;;  %v1530_v35 = vsel %vm466_vm15, %v1510_v61, %v1529_v47  ;;  %v2783_v31 = vor.u32 %v2983_v26, %v2780_v39  ;;  %vm4411_vm6 = vcmask 900096   ;;  %v4151_v26 = vld [vmem:[#allocation3 + $0x14] sm:$0xf] }
 0x37c   : > { %v1670_v37 = vsel %vm4398_vm2, %v1650_v5, %v1669_v33  ;;  %1539 = vst [vmem:[#allocation3 + $0x50] sm:$0xff] %v1530_v35  ;;  %v2786_v19 = vld [vmem:[#allocation4 + $0x50] sm:$0xf]  ;;  %v2985_v22 = vld [vmem:[#allocation4 + $0x54] sm:$0xf]  ;;  %vm4412_vm2 = vmmov %vm4401_vm0 }
 0x37d   : > { %1679 = vst [vmem:[#allocation4 + $0x10] sm:$0xff] %v1670_v37 }
 0x37e   : > { %v4127_v51 = vpop.permute.xlu2 %1579 }
 0x37f   : > { %v4123_v54 = vpop.permute.xlu1 %1719 }
 0x380   : > { %v1576_v45 = vpop.permute.xlu0 %1575  ;;  %v1728_v48 = vrot.slane %v4123_v54, 4 }
 0x381   : > { %v1586_v50 = vrot.slane %v1576_v45, 4 }
 0x383   : > { %v1593_v2 = vsel %vm4399_vm12, %v1585_v34, %v1586_v50  ;;  %vm4413_vm12 = vmmov %vm4401_vm0 }
 0x384   : > { %v1594_v9 = vsel %vm4400_vm11, %v1574_v0, %v1593_v2  ;;  %v2989_v0 = vld [vmem:[#allocation4 + $0x74] sm:$0xf]  ;;  %vm4414_vm11 = vmmov %vm4410_vm13  ;;  %v2754_v7 = vld [vmem:[#allocation4 + $0x10] sm:$0xf] }
 0x385   : > { %1603 = vst [vmem:[#allocation3 + $0x70] sm:$0xff] %v1594_v9 }
 0x386   : > { %v1508_v32 = vpop.permute.xlu2 %1507 }
 0x387   : > { %v4129_v10 = vpop.permute.xlu1 %1515  ;;  %v1520_v56 = vrot.slane %v1508_v32, 4 }
 0x388   : > { %v1840_v15 = vpop.permute.xlu0 %1839 }
 0x389   : > { %v1848_v52 = vrot.slane %v1840_v15, 4 }
 0x38b   : > { %v1855_v55 = vsel %vm4401_vm0, %v1847_v42, %v1848_v52  ;;  %vm4415_vm0 = vmmov %vm4414_vm11 }
 0x38c   : > { %v1856_v57 = vsel %vm4402_vm14, %v1838_v16, %v1855_v55  ;;  %v2795_v16 = vor.u32 %v2988_v1, %v2794_v6  ;;  %vm4416_vm14 = vmmov %vm4412_vm2 }
 0x38d   : > { %1864 = vst [vmem:[#allocation4 + $0x78] sm:$0xff] %v1856_v57 }
 0x38e   : > { %v1450_v11 = vpop.permute.xlu2 %1449 }
 0x38f   : > { %v1782_v41 = vpop.permute.xlu1 %1781  ;;  %v1459_v9 = vrot.slane %v1450_v11, 4 }
 0x390   : > { %v1656_v21 = vpop.permute.xlu0 %1655  ;;  %v1791_v43 = vrot.slane %v1782_v41, 4 }
 0x391   : > { %v1664_v46 = vrot.slane %v1656_v21, 4  ;;  %v2770_v21 = vld [vmem:[#allocation4 + $0x30] sm:$0xf] }
 0x392   : > { %v1799_v59 = vsel %vm4403_vm10, %v1791_v43, %v1792_v24  ;;  %v2981_v24 = vld [vmem:[#allocation4 + $0x34] sm:$0xf]  ;;  %vm4417_vm10 = vcmask 916480  }
 0x393   : > { %v1671_v62 = vsel %vm4404_vm7, %v1663_v29, %v1664_v46  ;;  %v1800_v38 = vsel %vm4405_vm1, %v1782_v41, %v1799_v59  ;;  %v2980_v59 = vld [vmem:[#allocation4 + $0x24] sm:$0xf0]  ;;  %vm4418_vm7 = vmmov %vm4412_vm2 }
 0x394   : > { %v1672_v4 = vsel %vm4406_vm5, %v1654_v40, %v1671_v62  ;;  %v2990_v14 = vld [vmem:[#allocation4 + $0x74] sm:$0xf0]  ;;  %v2804_v28 = vld [vmem:[#allocation4 + $0x78] sm:$0xf0]  ;;  %1808 = vst [vmem:[#allocation4 + $0x58] sm:$0xff] %v1800_v38  ;;  %vm4419_vm1 = vmmov %vm4412_vm2  ;;  %vm4420_vm5 = vcmask 769024  }
 0x395   : > { %v2803_v36 = vor.u32 %v2990_v14, %v2802_v27  ;;  %v2807_v58 = vor.u32 %v2989_v0, %v2804_v28  ;;  %1680 = vst [vmem:[#allocation4 + $0x18] sm:$0xff] %v1672_v4  ;;  %v2764_v62 = vld [vmem:[#allocation4 + $0x28] sm:$0xf0]  ;;  %v1588_v4 = vrot.slane %v4127_v51, 4  ;;  %v2762_v0 = vld [vmem:[#allocation4 + $0x20] sm:$0xf] }
 0x396   : > { %v1440_v34 = vpop.permute.xlu2 %1439  ;;  %v2979_v28 = vld [vmem:[#allocation4 + $0x24] sm:$0xf]  ;;  %v2976_v51 = vld [vmem:[#allocation4 + $0x4] sm:$0xf0] }
 0x397   : > { %1977 = vmatpush.bf16.msrb.mxu2 %v2803_v36  ;;  %1996 = vmatpush.bf16.msrb.mxu3 %v2807_v58  ;;  %v1506_v63 = vpop.permute.xlu1 %1505  ;;  %v1454_v54 = vrot.slane %v1440_v34, 4  ;;  %v2763_v36 = vor.u32 %v2980_v59, %v2762_v0  ;;  %v2767_v58 = vor.u32 %v2979_v28, %v2764_v62  ;;  %v2970_v34 = vld [vmem:[#allocation3 + $0x64] sm:$0xf0]  ;;  %v4164_v59 = vld [vmem:[#allocation3 + $0x18] sm:$0xf0] }
 0x398   : > { %v1446_v44 = vpop.permute.xlu0 %1445  ;;  %v1519_v13 = vrot.slane %v1506_v63, 4  ;;  %v4166_v62 = vld [vmem:[#allocation3 + $0x14] sm:$0xf0]  ;;  %v4170_v0 = vld [vmem:[#allocation3] sm:$0xf] }
 0x399   : > { %v1457_v49 = vrot.slane %v1446_v44, 4  ;;  %v2742_v28 = vld [vmem:[#allocation8 + $0x1c] sm:$0xf] }
 0x39a   : > { %v1527_v18 = vsel %vm4407_vm4, %v1519_v13, %v1520_v56  ;;  %v2977_v56 = vld [vmem:[#allocation4 + $0x14] sm:$0xf]  ;;  %vm4421_vm4 = vmmov %vm4415_vm0 }
 0x39b   : > { %1978 = vmatpush.bf16.msrb.mxu2 %v2795_v16  ;;  %1997 = vmatpush.bf16.msrb.mxu3 %v2799_v17  ;;  %v1528_v20 = vsel %vm466_vm15, %v1506_v63, %v1527_v18  ;;  %v2986_v53 = vld [vmem:[#allocation4 + $0x54] sm:$0xf0]  ;;  %v2788_v23 = vld [vmem:[#allocation4 + $0x58] sm:$0xf0]  ;;  %v2748_v17 = vld [vmem:[#allocation4 + $0x8] sm:$0xf0] }
 0x39c   : > { %1538 = vst [vmem:[#allocation3 + $0x48] sm:$0xff] %v1528_v20  ;;  %v2787_v8 = vor.u32 %v2986_v53, %v2786_v19  ;;  %v2791_v25 = vor.u32 %v2985_v22, %v2788_v23  ;;  %v2978_v3 = vld [vmem:[#allocation4 + $0x14] sm:$0xf0]  ;;  %v2756_v63 = vld [vmem:[#allocation4 + $0x18] sm:$0xf0] }
 0x39d   : > { %v2755_v13 = vor.u32 %v2978_v3, %v2754_v7  ;;  %v2759_v16 = vor.u32 %v2977_v56, %v2756_v63  ;;  %v2975_v20 = vld [vmem:[#allocation4 + $0x4] sm:$0xf]  ;;  %v2967_v3 = vld [vmem:[#allocation3 + $0x54] sm:$0xf] }
 0x39e   : > { %v2738_v53 = vld [vmem:[#allocation8 + $0x4] sm:$0xf]  ;;  %v2751_v12 = vor.u32 %v2975_v20, %v2748_v17 }
 0x39f   : > { %1979 = vmatpush.bf16.msrb.mxu2 %v2787_v8  ;;  %1998 = vmatpush.bf16.msrb.mxu3 %v2791_v25  ;;  %v1448_v61 = vpop.permute.xlu1 %1447 }
 0x3a0   : > { %v1718_v5 = vpop.permute.xlu0 %1717  ;;  %v1458_v47 = vrot.slane %v1448_v61, 4  ;;  %v4153_v61 = vld [vmem:[#allocation3 + $0x10] sm:$0xf] }
 0x3a1   : > { %v1727_v33 = vrot.slane %v1718_v5, 4 }
 0x3a2   : > { %v1465_v35 = vsel %vm4408_vm3, %v1457_v49, %v1458_v47  ;;  %vm4422_vm3 = vmmov %vm4419_vm1 }
 0x3a3   : > { %v1735_v37 = vsel %vm4409_vm9, %v1727_v33, %v1728_v48  ;;  %1980 = vmatpush.bf16.msrb.mxu2 %v2779_v30  ;;  %1999 = vmatpush.bf16.msrb.mxu3 %v2783_v31  ;;  %v1466_v40 = vsel %vm4410_vm13, %v1446_v44, %v1465_v35  ;;  %v2178_v44 = vpop.permute.xlu2 %2177  ;;  %v2874_v31 = vld [vmem:[#allocation3 + $0x70] sm:$0xf]  ;;  %v2971_v33 = vld [vmem:[#allocation3 + $0x74] sm:$0xf]  ;;  %vm4423_vm9 = vmmov %vm4419_vm1 }
 0x3a4   : > { %v1736_v45 = vsel %vm4411_vm6, %v1718_v5, %v1735_v37  ;;  %1475 = vst [vmem:[#allocation3 + $0x30] sm:$0xff] %v1466_v40  ;;  %v2189_v22 = vrot.slane %v2178_v44, 4  ;;  %v2739_v37 = vor.u32 %v2973_v60, %v2738_v53  ;;  %vm4424_vm13 = vmmov %vm4420_vm5  ;;  %v2966_v53 = vld [vmem:[#allocation3 + $0x44] sm:$0xf0] }
 0x3a5   : > { %1744 = vst [vmem:[#allocation4 + $0x38] sm:$0xff] %v1736_v45  ;;  %vm4425_vm6 = vmmov %vm4419_vm1 }
 0x3a7   : > { %v1438_v2 = vpop.permute.xlu1 %1437 }
 0x3a8   : > { %v1452_v50 = vpop.permute.xlu0 %1451  ;;  %v1453_v42 = vrot.slane %v1438_v2, 4 }
 0x3a9   : > { %v1460_v15 = vrot.slane %v1452_v50, 4  ;;  %v2868_v50 = vld [vmem:[#allocation3 + $0x68] sm:$0xf0] }
 0x3aa   : > { %v1461_v55 = vsel %vm4413_vm12, %v1453_v42, %v1454_v54  ;;  %v2969_v54 = vld [vmem:[#allocation3 + $0x64] sm:$0xf]  ;;  %vm4428_vm12 = vmmov %vm4420_vm5 }
 0x3ab   : > { %v1467_v52 = vsel %vm4412_vm2, %v1459_v9, %v1460_v15  ;;  %v1462_v41 = vsel %vm4415_vm0, %v1438_v2, %v1461_v55  ;;  %v2184_v2 = vpop.permute.xlu2 %2183  ;;  %v2866_v9 = vld [vmem:[#allocation3 + $0x60] sm:$0xf]  ;;  %v2871_v55 = vor.u32 %v2969_v54, %v2868_v50  ;;  %vm4427_vm2 = vmmov %vm4419_vm1 }
 0x3ac   : > { %v1468_v57 = vsel %vm4414_vm11, %v1450_v11, %v1467_v52  ;;  %v2982_v29 = vld [vmem:[#allocation4 + $0x34] sm:$0xf0]  ;;  %v2772_v43 = vld [vmem:[#allocation4 + $0x38] sm:$0xf0]  ;;  %1473 = vst [vmem:[#allocation3 + $0x20] sm:$0xff] %v1462_v41  ;;  %v2867_v52 = vor.u32 %v2970_v34, %v2866_v9  ;;  %v2192_v41 = vrot.slane %v2184_v2, 4 }
 0x3ad   : > { %1476 = vst [vmem:[#allocation3 + $0x38] sm:$0xff] %v1468_v57  ;;  %v2771_v46 = vor.u32 %v2982_v29, %v2770_v21  ;;  %v2775_v32 = vor.u32 %v2981_v24, %v2772_v43  ;;  %v2746_v11 = vld [vmem:[#allocation4] sm:$0xf]  ;;  %v1524_v57 = vrot.slane %v4129_v10, 4  ;;  %vm4429_vm11 = vcmask 261120  }
 0x3ae   : > { %v2747_v39 = vor.u32 %v2976_v51, %v2746_v11  ;;  %vm4430_vm0 = vmmov %vm4429_vm11 }
 0x3af   : > { %1981 = vmatpush.bf16.msrb.mxu2 %v2771_v46  ;;  %2000 = vmatpush.bf16.msrb.mxu3 %v2775_v32  ;;  %v1578_v38 = vpop.permute.xlu1 %1577 }
 0x3b0   : > { %v1442_v27 = vpop.permute.xlu0 %1441  ;;  %v1587_v14 = vrot.slane %v1578_v38, 4 }
 0x3b1   : > { %v1455_v23 = vrot.slane %v1442_v27, 4 }
 0x3b2   : > { %v1595_v1 = vsel %vm4416_vm14, %v1587_v14, %v1588_v4  ;;  %v4168_v14 = vld [vmem:[#allocation3 + $0x4] sm:$0xf]  ;;  %vm4431_vm14 = vmmov %vm4430_vm0 }
 0x3b3   : > { %v1596_v6 = vsel %vm4417_vm10, %v1578_v38, %v1595_v1  ;;  %1982 = vmatpush.bf16.msrb.mxu2 %v2763_v36  ;;  %2001 = vmatpush.bf16.msrb.mxu3 %v2767_v58  ;;  %v2974_v36 = vld [vmem:[#allocation8 + $0x24] sm:$0xf0]  ;;  %v2858_v1 = vld [vmem:[#allocation3 + $0x50] sm:$0xf]  ;;  %v2834_v2 = vld [vmem:[#allocation3 + $0x20] sm:$0xf] }
 0x3b4   : > { %1604 = vst [vmem:[#allocation3 + $0x78] sm:$0xff] %v1596_v6  ;;  %v2961_v9 = vld [vmem:[#allocation3 + $0x24] sm:$0xf]  ;;  %vm4432_vm10 = vmmov %vm4430_vm0 }
 0x3b7   : > { %1983 = vmatpush.bf16.msrb.mxu2 %v2755_v13  ;;  %2002 = vmatpush.bf16.msrb.mxu3 %v2759_v16  ;;  %v1444_v19 = vpop.permute.xlu1 %1443 }
 0x3b8   : > { %v2180_v18 = vpop.permute.xlu0 %2179  ;;  %v1456_v25 = vrot.slane %v1444_v19, 4  ;;  %v2174_v19 = vpop.permute.xlu2 %2173 }
 0x3b9   : > { %v2190_v8 = vrot.slane %v2180_v18, 4  ;;  %v2743_v18 = vor.u32 %v2974_v36, %v2742_v28  ;;  %v2187_v60 = vrot.slane %v2174_v19, 4  ;;  %v2814_v28 = vld [vmem:[#allocation8 + $0x18] sm:$0xf]  ;;  %v2956_v36 = vld [vmem:[#allocation8 + $0x20] sm:$0xf0] }
 0x3ba   : > { %v1463_v30 = vsel %vm4419_vm1, %v1455_v23, %v1456_v25  ;;  %v2965_v25 = vld [vmem:[#allocation3 + $0x44] sm:$0xf] }
 0x3bb   : > { %v2197_v5 = vsel %vm4418_vm7, %v2189_v22, %v2190_v8  ;;  %v1464_v49 = vsel %vm4421_vm4, %v1442_v27, %v1463_v30  ;;  %1984 = vmatpush.bf16.msrb.mxu2 %v2747_v39  ;;  %2003 = vmatpush.bf16.msrb.mxu3 %v2751_v12  ;;  %v2972_v47 = vld [vmem:[#allocation3 + $0x74] sm:$0xf0]  ;;  %v2876_v35 = vld [vmem:[#allocation3 + $0x78] sm:$0xf0]  ;;  %v2852_v22 = vld [vmem:[#allocation3 + $0x48] sm:$0xf0] }
 0x3bc   : > { %v2198_v48 = vsel %vm4420_vm5, %v2178_v44, %v2197_v5  ;;  %v2875_v40 = vor.u32 %v2972_v47, %v2874_v31  ;;  %v2879_v45 = vor.u32 %v2971_v33, %v2876_v35  ;;  %1474 = vst [vmem:[#allocation3 + $0x28] sm:$0xff] %v1464_v49  ;;  %v2850_v8 = vld [vmem:[#allocation3 + $0x40] sm:$0xf]  ;;  %v2855_v5 = vor.u32 %v2965_v25, %v2852_v22  ;;  %v2964_v30 = vld [vmem:[#allocation3 + $0x34] sm:$0xf0] }
 0x3bd   : > { %2207 = vst [vmem:[#allocation3 + $0x10] sm:$0xff] %v2198_v48  ;;  %v2851_v12 = vor.u32 %v2966_v53, %v2850_v8  ;;  %v2844_v31 = vld [vmem:[#allocation3 + $0x38] sm:$0xf0]  ;;  %v2820_v48 = vld [vmem:[#allocation3 + $0x8] sm:$0xf0]  ;;  %vm4433_vm7 = vcmask 908288  }
 0x3be   : > { %2107 = vmatpush.bf16.msra.mxu0 %v2875_v40  ;;  %2126 = vmatpush.bf16.msra.mxu1 %v2879_v45  ;;  %v2958_v47 = vld [vmem:[#allocation3 + $0x4] sm:$0xf0]  ;;  %v2842_v35 = vld [vmem:[#allocation3 + $0x30] sm:$0xf]  ;;  %vm4435_vm1 = vmmov %vm4433_vm7 }
 0x3bf   : > { %v2182_v42 = vpop.permute.xlu1 %2181  ;;  %1985 = vmatmul.bf16.vlgmr.msrb.gmra.mxu2 %v2739_v37  ;;  %2004 = vmatmul.bf16.vlgmr.msrb.gmra.mxu3 %v2739_v37  ;;  %v2963_v37 = vld [vmem:[#allocation3 + $0x34] sm:$0xf]  ;;  %v2843_v40 = vor.u32 %v2964_v30, %v2842_v35  ;;  %vm4437_vm4 = vmmov %vm4435_vm1 }
 0x3c0   : > { %v1514_v15 = vpop.permute.xlu0 %1513  ;;  %v2191_v24 = vrot.slane %v2182_v42, 4  ;;  %v2847_v45 = vor.u32 %v2963_v37, %v2844_v31  ;;  %v2311_v31 = vpop.permute.xlu2 %2310 }
 0x3c1   : > { %v1523_v21 = vrot.slane %v1514_v15, 4 }
 0x3c2   : > { %v2199_v43 = vsel %vm4423_vm9, %v2191_v24, %v2192_v41  ;;  %2108 = vmatpush.bf16.msra.mxu0 %v2867_v52  ;;  %2127 = vmatpush.bf16.msra.mxu1 %v2871_v55  ;;  %v2882_v52 = vld [vmem:[#allocation8 + $0x8] sm:$0xf]  ;;  %v2991_v55 = vld [vmem:[#allocation8 + $0x10] sm:$0xf0]  ;;  %v2827_v24 = vor.u32 %v4166_v62, %v4153_v61  ;;  %vm4439_vm9 = vmmov %vm4435_vm1 }
 0x3c3   : > { %v1531_v29 = vsel %vm4422_vm3, %v1523_v21, %v1524_v57  ;;  %v2200_v32 = vsel %vm4424_vm13, %v2182_v42, %v2199_v43  ;;  %v2962_v34 = vld [vmem:[#allocation3 + $0x24] sm:$0xf0]  ;;  %v2836_v50 = vld [vmem:[#allocation3 + $0x28] sm:$0xf0]  ;;  %vm4438_vm3 = vmmov %vm4435_vm1 }
 0x3c4   : > { %v1532_v46 = vsel %vm466_vm15, %v1514_v15, %v1531_v29  ;;  %2208 = vst [vmem:[#allocation3 + $0x18] sm:$0xff] %v2200_v32  ;;  %v2898_v63 = vld [vmem:[#allocation3 + $0x10] sm:$0xf]  ;;  %vm4426_vm15 = vmmov %vm4420_vm5  ;;  %v2995_v56 = vld [vmem:[#allocation3 + $0x14] sm:$0xf]  ;;  %v2835_v54 = vor.u32 %v2962_v34, %v2834_v2  ;;  %v2839_v15 = vor.u32 %v2961_v9, %v2836_v50  ;;  %v2831_v29 = vor.u32 %v4151_v26, %v4164_v59 }
 0x3c5   : > { %1540 = vst [vmem:[#allocation3 + $0x58] sm:$0xff] %v1532_v46  ;;  %v2883_v32 = vor.u32 %v2991_v55, %v2882_v52  ;;  %v2886_v26 = vld [vmem:[#allocation8 + $0x20] sm:$0xf]  ;;  %v2992_v59 = vld [vmem:[#allocation8 + $0x28] sm:$0xf0]  ;;  %vm4436_vm5 = vmmov %vm4435_vm1 }
 0x3c6   : > { %v2887_v62 = vor.u32 %v2992_v59, %v2886_v26  ;;  %vm4440_vm13 = vmmov %vm4435_vm1 }
 0x3c7   : > { %v2172_v27 = vpop.permute.xlu1 %2171 }
 0x3c8   : > { %v2170_v10 = vpop.permute.xlu0 %2169  ;;  %v2186_v4 = vrot.slane %v2172_v27, 4  ;;  %v2955_v27 = vld [vmem:[#allocation8 + $0x8] sm:$0xf0] }
 0x3c9   : > { %v2185_v38 = vrot.slane %v2170_v10, 4 }
 0x3cb   : > { %v2193_v58 = vsel %vm4425_vm6, %v2185_v38, %v2186_v4  ;;  %v2996_v51 = vld [vmem:[#allocation3 + $0x14] sm:$0xf0]  ;;  %v2900_v17 = vld [vmem:[#allocation3 + $0x18] sm:$0xf0]  ;;  %v2819_v38 = vor.u32 %v2958_v47, %v4170_v0  ;;  %v2823_v4 = vor.u32 %v4168_v14, %v2820_v48  ;;  %v2815_v0 = vor.u32 %v2956_v36, %v2814_v28  ;;  %v2336_v28 = vld [vmem:[%s3361_s9 + $0x28] sm:$0xff] }
 0x3cc   : > { %v2194_v44 = vsel %vm4426_vm15, %v2170_v10, %v2193_v58  ;;  %v2968_v6 = vld [vmem:[#allocation3 + $0x54] sm:$0xf0]  ;;  %v2860_v7 = vld [vmem:[#allocation3 + $0x58] sm:$0xf0]  ;;  %v2899_v11 = vor.u32 %v2996_v51, %v2898_v63  ;;  %v2903_v20 = vor.u32 %v2995_v56, %v2900_v17  ;;  %v2810_v10 = vld [vmem:[#allocation8] sm:$0xf] }
 0x3cd   : > { %2205 = vst [vmem:[#allocation3] sm:$0xff] %v2194_v44  ;;  %v2859_v13 = vor.u32 %v2968_v6, %v2858_v1  ;;  %v2863_v16 = vor.u32 %v2967_v3, %v2860_v7  ;;  %v2811_v61 = vor.u32 %v2955_v27, %v2810_v10 }
 0x3ce   : > { %2259 = vmatpush.bf16.msra.mxu2 %v2899_v11  ;;  %2278 = vmatpush.bf16.msra.mxu3 %v2903_v20 }
 0x3cf   : > { %2109 = vmatpush.bf16.msra.mxu0 %v2859_v13  ;;  %2128 = vmatpush.bf16.msra.mxu1 %v2863_v16  ;;  %v2306_v20 = vpop.permute.xlu1 %2305 }
 0x3d0   : > { %v2176_v23 = vpop.permute.xlu0 %2175  ;;  %1990 = vmatmul.bf16.gmra.mxu2 %v2743_v18  ;;  %2009 = vmatmul.bf16.gmra.mxu3 %v2743_v18 }
 0x3d1   : > { %v2188_v39 = vrot.slane %v2176_v23, 4 }
 0x3d3   : > { %v2195_v49 = vsel %vm4427_vm2, %v2187_v60, %v2188_v39  ;;  %2110 = vmatpush.bf16.msra.mxu0 %v2851_v12  ;;  %2129 = vmatpush.bf16.msra.mxu1 %v2855_v5 }
 0x3d4   : > { %v2196_v33 = vsel %vm4428_vm12, %v2174_v19, %v2195_v49  ;;  %v2890_v42 = vld [vmem:[#allocation3] sm:$0xf]  ;;  %v2993_v41 = vld [vmem:[#allocation3 + $0x4] sm:$0xf] }
 0x3d5   : > { %2206 = vst [vmem:[#allocation3 + $0x8] sm:$0xff] %v2196_v33 }
 0x3d7   : > { %2111 = vmatpush.bf16.msra.mxu0 %v2843_v40  ;;  %2130 = vmatpush.bf16.msra.mxu1 %v2847_v45 }
 0x3d8   : > { %v2316_v2 = vpop.permute.xlu0 %2315 }
 0x3db   : > { %2112 = vmatpush.bf16.msra.mxu0 %v2835_v54  ;;  %2131 = vmatpush.bf16.msra.mxu1 %v2839_v15 }
 0x3dc   : > { %v2994_v57 = vld [vmem:[#allocation3 + $0x4] sm:$0xf0]  ;;  %v2892_v21 = vld [vmem:[#allocation3 + $0x8] sm:$0xf0] }
 0x3dd   : > { %v2891_v43 = vor.u32 %v2994_v57, %v2890_v42  ;;  %v2895_v46 = vor.u32 %v2993_v41, %v2892_v21 }
 0x3df   : > { %2113 = vmatpush.bf16.msra.mxu0 %v2827_v24  ;;  %2132 = vmatpush.bf16.msra.mxu1 %v2831_v29  ;;  %v2321_v29 = vpop.permute.xlu1 %2320 }
 0x3e0   : > { %2260 = vmatpush.bf16.msra.mxu2 %v2891_v43  ;;  %2279 = vmatpush.bf16.msra.mxu3 %v2895_v46 }
 0x3e3   : > { %2904 = vmatmul.msk.bf16.vlgmr.msra.gmra.mxu2 %vm4429_vm11, %v2883_v32  ;;  %2906 = vmatmul.msk.bf16.vlgmr.msra.gmra.mxu3 %vm4430_vm0, %v2883_v32  ;;  %v2331_v32 = vld [vmem:[%s3361_s9] sm:$0xff] }
 0x3e4   : > { %2114 = vmatpush.bf16.msra.mxu0 %v2819_v38  ;;  %2133 = vmatpush.bf16.msra.mxu1 %v2823_v4  ;;  %v2333_v38 = vld [vmem:[%s3361_s9 + $0x10] sm:$0xff]  ;;  %v2332_v4 = vld [vmem:[%s3361_s9 + $0x8] sm:$0xff] }
 0x3e7   : > { %2115 = vmatmul.bf16.vlgmr.msra.gmra.mxu0 %v2811_v61  ;;  %2134 = vmatmul.bf16.vlgmr.msra.gmra.mxu1 %v2811_v61 }
 0x3f3   : > { %2905 = vmatmul.msk.bf16.gmra.mxu2 %vm4431_vm14, %v2887_v62  ;;  %2907 = vmatmul.msk.bf16.gmra.mxu3 %vm4432_vm10, %v2887_v62 }
 0x3f7   : > { %2120 = vmatmul.bf16.gmra.mxu0 %v2815_v0  ;;  %2139 = vmatmul.bf16.gmra.mxu1 %v2815_v0  ;;  %v2334_v0 = vld [vmem:[%s3361_s9 + $0x18] sm:$0xff] }
 0x442   : > { %v1986_v14 = vpop.f32.mrf.mxu2  ;;  %v2005_v58 = vpop.f32.mrf.mxu3 }
 0x44a   : > { %v1988_v1 = vpop.f32.mrf.mxu2  ;;  %v2007_v3 = vpop.f32.mrf.mxu3 }
 0x453   : > { %v1991_v63 = vpop.f32.mrf.mxu2  ;;  %v2010_v44 = vpop.f32.mrf.mxu3 }
 0x45b   : > { %v1993_v6 = vpop.f32.mrf.mxu2  ;;  %v2012_v7 = vpop.f32.mrf.mxu3 }
 0x464   : > { %v2116_v56 = vpop.f32.mrf.mxu0  ;;  %v2135_v13 = vpop.f32.mrf.mxu1 }
 0x465   : > { %v2117_v16 = vadd.f32 %v2116_v56, %v1986_v14  ;;  %v2136_v51 = vadd.f32 %v2135_v13, %v2005_v58  ;;  %v2335_v14 = vld [vmem:[%s3361_s9 + $0x20] sm:$0xff]  ;;  %v2338_v56 = vld [vmem:[%s3361_s9 + $0x38] sm:$0xff] }
 0x466   : > { %v2262_v17 = vpop.f32.mrf.mxu2  ;;  %v2281_v18 = vpop.f32.mrf.mxu3 }
 0x467   : > { %v2291_v19 = vadd.f32 %v2262_v17, %v2117_v16  ;;  %v2292_v11 = vadd.f32 %v2281_v18, %v2136_v51 }
 0x469   : > { %v2323_v53 = vadd.f32 %v2306_v20, %v2291_v19  ;;  %v2324_v22 = vadd.f32 %v2306_v20, %v2292_v11  ;;  %v2340_v11 = vld [vmem:[%s3361_s9 + $0x48] sm:$0xff] }
 0x46b   : > { %2351 = vrot.lane.b32.xlu2 %v2323_v53, %s3232_s29  ;;  %2353 = vrot.lane.b32.xlu0 %v2324_v22, %s3232_s29  ;;  %v2342_v53 = vld [vmem:[%s3361_s9 + $0x58] sm:$0xff]  ;;  %v2341_v22 = vld [vmem:[%s3361_s9 + $0x50] sm:$0xff] }
 0x46c   : > { %v2118_v23 = vpop.f32.mrf.mxu0  ;;  %v2137_v8 = vpop.f32.mrf.mxu1 }
 0x46d   : > { %v2119_v25 = vadd.f32 %v2118_v23, %v1988_v1  ;;  %v2138_v60 = vadd.f32 %v2137_v8, %v2007_v3 }
 0x46e   : > { %v2264_v39 = vpop.f32.mrf.mxu2  ;;  %v2283_v12 = vpop.f32.mrf.mxu3 }
 0x46f   : > { %v2293_v5 = vadd.f32 %v2264_v39, %v2119_v25  ;;  %v2294_v30 = vadd.f32 %v2283_v12, %v2138_v60 }
 0x471   : > { %v2325_v48 = vadd.f32 %v2311_v31, %v2293_v5  ;;  %v2326_v49 = vadd.f32 %v2311_v31, %v2294_v30 }
 0x473   : > { %2355 = vrot.lane.b32.xlu1 %v2325_v48, %s3232_s29  ;;  %2357 = vrot.lane.b32.xlu2 %v2326_v49, %s3232_s29 }
 0x474   : > { %v2121_v47 = vpop.f32.mrf.mxu0  ;;  %v2140_v33 = vpop.f32.mrf.mxu1 }
 0x475   : > { %v2122_v35 = vadd.f32 %v2121_v47, %v1991_v63  ;;  %v2141_v37 = vadd.f32 %v2140_v33, %v2010_v44 }
 0x476   : > { %v2267_v40 = vpop.f32.mrf.mxu2  ;;  %v2286_v45 = vpop.f32.mrf.mxu3 }
 0x477   : > { %v2295_v34 = vadd.f32 %v2267_v40, %v2122_v35  ;;  %v2296_v50 = vadd.f32 %v2286_v45, %v2141_v37 }
 0x479   : > { %v2327_v9 = vadd.f32 %v2316_v2, %v2295_v34  ;;  %v2328_v54 = vadd.f32 %v2316_v2, %v2296_v50 }
 0x47b   : > { %2361 = vrot.lane.b32.xlu1 %v2328_v54, %s3232_s29  ;;  %2359 = vrot.lane.b32.xlu0 %v2327_v9, %s3232_s29 }
 0x47c   : > { %v2123_v15 = vpop.f32.mrf.mxu0  ;;  %v2142_v42 = vpop.f32.mrf.mxu1 }
 0x47d   : > { %v2124_v52 = vadd.f32 %v2123_v15, %v1993_v6  ;;  %v2143_v55 = vadd.f32 %v2142_v42, %v2012_v7  ;;  %v2339_v6 = vld [vmem:[%s3361_s9 + $0x40] sm:$0xff]  ;;  %v2337_v7 = vld [vmem:[%s3361_s9 + $0x30] sm:$0xff]  ;;  %s2997_s9 = sshll.u32 %s3285_s22, 6  ;;  %s2458_s22 = scalar_lea.sflag [#allocation7], %s3357_s26 }
 0x47e   : > { %v2269_v57 = vpop.f32.mrf.mxu2  ;;  %v2288_v41 = vpop.f32.mrf.mxu3  ;;  %s2469_s30 = scalar_lea.hbm %s4281_s5, %s2997_s9 }
 0x47f   : > { %v2297_v21 = vadd.f32 %v2269_v57, %v2124_v52  ;;  %v2298_v24 = vadd.f32 %v2288_v41, %v2143_v55  ;;  %s2472_s24 = sshll.u32 %s2469_s30, 4  ;;  %s2473_s24 = int_to_ptr.hbm [resolvable:$true] %s2472_s24 }
 0x480   : > { %s3155_s11 = sshra.s32 %s2473_s24, 4  ;;  %s3156_s11 = int_to_ptr.hbm [resolvable:$true] %s3155_s11 }
 0x481   : > { %v2329_v43 = vadd.f32 %v2321_v29, %v2297_v21  ;;  %v2330_v46 = vadd.f32 %v2321_v29, %v2298_v24  ;;  %s3157_s15 = scalar_lea.hbm %s3156_s11, 64  ;;  %p3162_p11 = scmp.lt.s32.totalorder %s3156_s11, %s4281_s5 }
 0x482   : > { %p3158_p1 = scmp.ne.s32.totalorder %s3156_s11, %s3157_s15  ;;  %p3163_p9 = scmp.lt.s32.totalorder %s3161_s14, %s3157_s15 }
 0x483   : > { %2363 = vrot.lane.b32.xlu2 %v2329_v43, %s3232_s29  ;;  %2365 = vrot.lane.b32.xlu0 %v2330_v46, %s3232_s29  ;;  %s2470_s29 = sshll.u32 %s4224_s16, 4  ;;  %s2471_s29 = int_to_ptr.vmem [resolvable:$true] %s2470_s29 }
 0x484   : > { %p3159_p4 = pnand %p3158_p1, %p3331_p7  ;;  %p3164_p2 = por %p3163_p9, %p3162_p11 }
 0x486   : > { %p3160_p8 = pneg %p3159_p4 }
 0x488   : > { %p3165_p10 = pnand %p3164_p2, %p3160_p8 }
 0x4c5   : > { %v2352_v10 = vpop.permute.xlu2 %2351 }
 0x4c6   : > { %v2384_v27 = vadd.f32 %v2352_v10, %v2331_v32 }
 0x4c8   : > { %2408 = vrot.lane.b32.xlu1 %v2384_v27, %s3225_s10 }
 0x4cd   : > { %v2358_v36 = vpop.permute.xlu2 %2357 }
 0x4ce   : > { %v2389_v1 = vadd.f32 %v2358_v36, %v2336_v28 }
 0x4dd   : > { %v2354_v61 = vpop.permute.xlu0 %2353  ;;  %v2364_v20 = vpop.permute.xlu2 %2363 }
 0x4de   : > { %v2368_v26 = vsel %vm1384_vm8, %v2352_v10, %v2354_v61  ;;  %v2386_v59 = vadd.f32 %v2354_v61, %v2333_v38  ;;  %v2393_v8 = vadd.f32 %v2364_v20, %v2340_v11 }
 0x4df   : > { %v2385_v62 = vadd.f32 %v2368_v26, %v2332_v4 }
 0x4e0   : > { %2412 = vrot.lane.b32.xlu0 %v2386_v59, %s3225_s10 }
 0x4e1   : > { %2410 = vrot.lane.b32.xlu2 %v2385_v62, %s3225_s10 }
 0x4e5   : > { %v2356_v58 = vpop.permute.xlu1 %2355 }
 0x4e6   : > { %v2369_v3 = vsel %vm1384_vm8, %v2356_v58, %v2358_v36  ;;  %v2387_v63 = vadd.f32 %v2356_v58, %v2334_v0 }
 0x4e7   : > { %v2388_v44 = vadd.f32 %v2369_v3, %v2335_v14 }
 0x4e8   : > { %2414 = vrot.lane.b32.xlu1 %v2387_v63, %s3225_s10  ;;  %2418 = vrot.lane.b32.xlu0 %v2389_v1, %s3225_s10 }
 0x4e9   : > { %2416 = vrot.lane.b32.xlu2 %v2388_v44, %s3225_s10 }
 0x4ed   : > { %v2362_v13 = vpop.permute.xlu1 %2361  ;;  %v2360_v16 = vpop.permute.xlu0 %2359 }
 0x4ee   : > { %v2392_v51 = vadd.f32 %v2362_v13, %v2339_v6  ;;  %v2370_v17 = vsel %vm1384_vm8, %v2360_v16, %v2362_v13  ;;  %v2390_v18 = vadd.f32 %v2360_v16, %v2337_v7 }
 0x4ef   : > { %v2391_v19 = vadd.f32 %v2370_v17, %v2338_v56 }
 0x4f0   : > { %2424 = vrot.lane.b32.xlu0 %v2392_v51, %s3225_s10  ;;  %2420 = vrot.lane.b32.xlu1 %v2390_v18, %s3225_s10 }
 0x4f1   : > { %2422 = vrot.lane.b32.xlu2 %v2391_v19, %s3225_s10 }
 0x4f5   : > { %v2366_v23 = vpop.permute.xlu0 %2365 }
 0x4f6   : > { %v2371_v25 = vsel %vm1384_vm8, %v2364_v20, %v2366_v23  ;;  %v2395_v60 = vadd.f32 %v2366_v23, %v2342_v53  ;;  %vm4434_vm8 = vmmov %vm4433_vm7 }
 0x4f7   : > { %v2394_v39 = vadd.f32 %v2371_v25, %v2341_v22 }
 0x4f8   : > { %2426 = vrot.lane.b32.xlu1 %v2393_v8, %s3225_s10  ;;  %2430 = vrot.lane.b32.xlu0 %v2395_v60, %s3225_s10 }
 0x4f9   : > { %2428 = vrot.lane.b32.xlu2 %v2394_v39, %s3225_s10 }
 0x53a   : > { %v2409_v12 = vpop.permute.xlu1 %2408 }
 0x53b   : > { %v2411_v5 = vpop.permute.xlu2 %2410 }
 0x53c   : > { %v2433_v30 = vsel %vm4433_vm7, %v2409_v12, %v2411_v5 }
 0x53d   : > { %2449 = vst [vmem:[%s4224_s16] sm:$0xff] %v2433_v30 }
 0x543   : > { %v2417_v49 = vpop.permute.xlu2 %2416 }
 0x54b   : > { %v2423_v40 = vpop.permute.xlu2 %2422 }
 0x552   : > { %v2413_v31 = vpop.permute.xlu0 %2412 }
 0x553   : > { %v2434_v48 = vsel %vm4434_vm8, %v2411_v5, %v2413_v31  ;;  %v2429_v9 = vpop.permute.xlu2 %2428 }
 0x554   : > { %2450 = vst [vmem:[%s4224_s16 + $0x8] sm:$0xff] %v2434_v48 }
 0x55a   : > { %v2415_v47 = vpop.permute.xlu1 %2414  ;;  %v2419_v33 = vpop.permute.xlu0 %2418 }
 0x55b   : > { %v2435_v35 = vsel %vm4435_vm1, %v2415_v47, %v2417_v49  ;;  %v2436_v37 = vsel %vm4436_vm5, %v2417_v49, %v2419_v33 }
 0x55c   : > { %2451 = vst [vmem:[%s4224_s16 + $0x10] sm:$0xff] %v2435_v35 }
 0x55d   : > { %2452 = vst [vmem:[%s4224_s16 + $0x18] sm:$0xff] %v2436_v37 }
 0x562   : > { %v2421_v45 = vpop.permute.xlu1 %2420  ;;  %v2425_v34 = vpop.permute.xlu0 %2424 }
 0x563   : > { %v2437_v50 = vsel %vm4437_vm4, %v2421_v45, %v2423_v40  ;;  %v2438_v2 = vsel %vm4438_vm3, %v2423_v40, %v2425_v34 }
 0x564   : > { %2453 = vst [vmem:[%s4224_s16 + $0x20] sm:$0xff] %v2437_v50 }
 0x565   : > { %2454 = vst [vmem:[%s4224_s16 + $0x28] sm:$0xff] %v2438_v2 }
 0x56a   : > { %v2427_v54 = vpop.permute.xlu1 %2426  ;;  %v2431_v15 = vpop.permute.xlu0 %2430 }
 0x56b   : > { %v2439_v42 = vsel %vm4439_vm9, %v2427_v54, %v2429_v9  ;;  %v2440_v52 = vsel %vm4440_vm13, %v2429_v9, %v2431_v15 }
 0x56c   : > { %2455 = vst [vmem:[%s4224_s16 + $0x30] sm:$0xff] %v2439_v42 }
 0x56d   : > { %2456 = vst [vmem:[%s4224_s16 + $0x38] sm:$0xff] %v2440_v52 }
 0x56e   : > { %3168 = shalt.err (!%p3165_p10)
}
 0x56f   : > { %s3233_s26 = smov 256   ;;  %s4441_s8 = smov 16  }
 0x570   : > { %3007 = dma.vmem_to_hbm [thread:$0]  (%p3331_p7), %s2471_s29, 1024, %s2473_s24, %s2458_s22, %s3233_s26, %s3233_s26, %s4441_s8  }
 0x571 PF: > { %s2487_s27 = sand.u32 1, %s3199_s18   ;;  %p4442_p12 = scmp.ge.s32.totalorder %s3211_s21, 2 }
 0x572   : > { %s2488_s16 = scalar_lea.sflag [#allocation7], %s2487_s27 }
 0x573   : > { %p3018_p13 = pnand %p4442_p12, %p3299_p6 }
 0x575   : > { %p3019_p0 = pneg %p3018_p13 }
 0x577   : > { %3194 = dma.done.wait (%p3019_p0), %s2488_s16, 1024  }
 0x578   : > { %3196 = vsyncadd (%p3019_p0), %s2488_s16, 4294966272  ;;  %p19_p3 = scmp.ge.s32.totalorder %s3317_s7, 4   ;;  %s4443_s18 = smov %s3203_s19 }
 0x579   : > { %s4444_s19 = smov %s3207_s20  ;;  %s4445_s20 = smov %s3327_s12 }
 0x57a   : > { %s4446_s21 = smov %s3317_s7  ;;  %21 = sbr.rel (!%p19_p3) target bundleno = 8 (0x8), region = 89 }
 0x57f   :  { %2494 = vsyncpa [#allocation6], 1 }
 0x580   :  { %2496 = vsyncpa [#allocation6 + $0x1], 1 }
 0x581   :  { %2497 = vsyncpa [#allocation9], 1 }
 0x582   :  { %2498 = vsyncpa [#allocation7], 1 }
 0x583   :  { %2500 = vsyncpa [#allocation7 + $0x1], 1 }

</bundles_post_ra>
